<compile_context>
chip_gen: v6e
topology: v6e:2x2x1
jax: 0.10.0
libtpu: 0.0.40
codegen_flags: <defaults>
</compile_context>

<pallas_src>
import math
from functools import partial

import numpy as np
import jax
import jax.numpy as jnp
from jax.experimental import pallas as pl
from jax.experimental.pallas import tpu as pltpu

# ---------------------------------------------------------------------------
# hyper-parameters (small, consistent with the module)
# ---------------------------------------------------------------------------
EMB = 32            # _embsize
K_KERNELS = 11      # n_kernels
PROJ = 32           # projection_dim (= values_dim = attention_dim)
HEADS = 32          # num_attention_heads
FF_HID = 100        # feedforward_hidden_dim
CONV_OUT = 300      # conv_out_dim
NGRAMS = [2, 3, 4]  # range(2, n_grams + 1)
PROX_RANGE = list(range(2, 14))     # [2..13]
B, QLEN, DLEN = 2, 8, 16

OUT_ROWS = 16       # >= max(NB*B, K), multiple of 8
OUT_W = 128         # lane-dense output slab width


# ---------------------------------------------------------------------------
# mu / sigma helpers (verbatim port of kernel_mus / kernel_sigmas)
# ---------------------------------------------------------------------------
def kernel_mus(n_kernels):
    l_mu = [1.0]
    if n_kernels == 1:
        return l_mu
    bin_size = 2.0 / (n_kernels - 1)
    l_mu.append(1 - bin_size / 2)
    for i in range(1, n_kernels - 1):
        l_mu.append(l_mu[i] - bin_size)
    return l_mu


def kernel_sigmas(n_kernels):
    bin_size = 2.0 / (n_kernels - 1)
    l_sigma = [0.0001]
    if n_kernels == 1:
        return l_sigma
    l_sigma += [0.5 * bin_size] * (n_kernels - 1)
    return l_sigma


# ---------------------------------------------------------------------------
# fused Pallas kernel: cosine match -> gaussian kernel pooling (+ proximity)
# ---------------------------------------------------------------------------
def _fused_pool_body(q_ref, d_ref, mu_row_ref, c_row_ref, mu_col_ref,
                     c_col_ref, rep_ref, ksum_ref, dmK_ref, invdl_ref,
                     qselT_ref, pool_ref, dmt_ref, segP_ref, out_ref,
                     *, Bn, P, K, Dl):
    q = q_ref[...]                                  # (NBB, Q, EP)  f32
    d = d_ref[...]                                  # (NBB, Dl, EP) f32
    NBB, Q, _ = q.shape

    # --- CosineMatrixAttention: f32 normalize (rsqrt on EUP), bf16 MXU dot --
    qn = q * jax.lax.rsqrt(jnp.sum(q * q, axis=-1, keepdims=True) + 1e-26)
    dn = d * jax.lax.rsqrt(jnp.sum(d * d, axis=-1, keepdims=True) + 1e-26)
    s = jnp.einsum('bqe,bke->bqk',
                   qn.astype(jnp.bfloat16), dn.astype(jnp.bfloat16),
                   preferred_element_type=jnp.float32)          # (NBB, Q, Dl)

    # --- gaussian kernel pooling, lane-dense (K replicated onto lanes) -----
    s2 = s.reshape(NBB * Q, Dl)                     # layout-preserving reshape
    s_rep = jnp.dot(s2, rep_ref[...],
                    preferred_element_type=jnp.float32)         # (NBB*Q, K*Dl)
    diff = s_rep - mu_row_ref[...]                  # (1, K*Dl) broadcast
    r = jnp.exp(diff * diff * c_row_ref[...])       # single lane-dense exp
    r = r * dmK_ref[...]                            # document mask
    # masked reduce over doc positions as ONE MXU matmul (static segment-sum)
    kq = jnp.dot(r, ksum_ref[...],
                 preferred_element_type=jnp.float32)            # (NBB*Q, K)

    # log-sum / log-mean pooling over query positions (query mask folded into
    # the per-batch selector matrix -> two small MXU matmuls)
    lsum = jnp.log(jnp.maximum(kq, 1e-10))
    lmean = jnp.log(jnp.maximum(kq * invdl_ref[...], 1e-10))
    qsel = qselT_ref[...]                           # (NBB, NBB*Q)
    sum_t = jnp.dot(qsel, lsum, preferred_element_type=jnp.float32)   # (NBB,K)
    mean_t = jnp.dot(qsel, lmean, preferred_element_type=jnp.float32)  # (NBB,K)

    # --- proximity branch (one-to-one match matrix only, branches 0..B-1) --
    mu_c = mu_col_ref[...]                          # (K, 1)
    c_c = c_col_ref[...]                            # (K, 1)
    mx = jnp.max(s[0:Bn], axis=1)                   # (Bn, Dl) max over query
    pooled = jnp.dot(mx, pool_ref[...],
                     preferred_element_type=jnp.float32)        # (Bn, P*Dl)

    # --- single lane-dense (OUT_ROWS, 128) output slab ----------------------
    out_ref[...] = jnp.zeros(out_ref.shape, jnp.float32)
    out_ref[0:NBB, 0:K] = sum_t
    out_ref[0:NBB, K:2 * K] = mean_t
    for b in range(Bn):                             # Bn == 2, static unroll
        dp = pooled[b:b + 1, :] - mu_c              # (K, P*Dl)
        rp = jnp.exp(dp * dp * c_c) * dmt_ref[b:b + 1, :]
        prox_b = jnp.dot(rp, segP_ref[...],
                         preferred_element_type=jnp.float32)    # (K, P)
        out_ref[0:K, 2 * K + b * P:2 * K + (b + 1) * P] = prox_b


def fused_kernel_pool(q_stack, d_stack, q_mask, d_mask, mu, sigma, pool_cat):
    """q_stack/d_stack: (NB, B, Q/D, E_pad).
    Returns sum_k (NB,B,K), mean_k (NB,B,K), prox_summed (B,P,K)."""
    NB_, Bn, Q, EP = q_stack.shape
    Dl = d_stack.shape[2]
    K = mu.shape[0]
    P = pool_cat.shape[1] // Dl
    NBB = NB_ * Bn

    q_all = q_stack.reshape(NBB, Q, EP).astype(jnp.float32)
    d_all = d_stack.reshape(NBB, Dl, EP).astype(jnp.float32)

    qm = q_mask.astype(jnp.float32)                 # (Bn, Q)
    dm = d_mask.astype(jnp.float32)                 # (Bn, Dl)

    mu_f = mu.astype(jnp.float32)
    c_f = -1.0 / (2.0 * sigma.astype(jnp.float32) ** 2)
    mu_col = mu_f.reshape(K, 1)
    c_col = c_f.reshape(K, 1)
    mu_row = jnp.repeat(mu_f, Dl).reshape(1, K * Dl)
    c_row = jnp.repeat(c_f, Dl).reshape(1, K * Dl)

    # static replication / segment-sum matrices (built host-side once)
    repmat = jnp.asarray(np.tile(np.eye(Dl, dtype=np.float32), (1, K)))   # (Dl, K*Dl)
    ksum = jnp.asarray(np.repeat(np.eye(K, dtype=np.float32), Dl, axis=0))  # (K*Dl, K)
    segP = jnp.asarray(np.repeat(np.eye(P, dtype=np.float32), Dl, axis=0))  # (P*Dl, P)

    # document mask replicated over kernels, broadcast over (branch, query)
    dmK_b = jnp.tile(dm, (1, K))                                 # (Bn, K*Dl)
    dmK = jnp.tile(jnp.repeat(dmK_b, Q, axis=0), (NB_, 1))       # (NBB*Q, K*Dl)

    # 1/doc_len per flattened (branch,batch,query) row  (matches reference)
    doc_len = jnp.sum(dm, axis=1)                                # (Bn,)
    invdl = 1.0 / doc_len
    invdl_col = jnp.tile(jnp.repeat(invdl, Q), NB_).reshape(NBB * Q, 1)

    # per-batch query-sum selector with the query mask folded in: (NBB, NBB*Q)
    qm_bbq = jnp.tile(qm.reshape(Bn * Q), NB_)                   # (NBB*Q,)
    sel = np.repeat(np.eye(NBB, dtype=np.float32), Q, axis=1)    # (NBB, NBB*Q)
    qselT = jnp.asarray(sel) * qm_bbq[None, :]

    # doc mask tiled over the proximity windows: (Bn, P*Dl)
    dmt = jnp.tile(dm, (1, P))

    kernel = partial(_fused_pool_body, Bn=Bn, P=P, K=K, Dl=Dl)

    grid_spec = pltpu.PrefetchScalarGridSpec(
        num_scalar_prefetch=0,
        grid=(1,),                                   # collapsed grid
        in_specs=[
            pl.BlockSpec((NBB, Q, EP), lambda i: (0, 0, 0)),
            pl.BlockSpec((NBB, Dl, EP), lambda i: (0, 0, 0)),
            pl.BlockSpec((1, K * Dl), lambda i: (0, 0)),
            pl.BlockSpec((1, K * Dl), lambda i: (0, 0)),
            pl.BlockSpec((K, 1), lambda i: (0, 0)),
            pl.BlockSpec((K, 1), lambda i: (0, 0)),
            pl.BlockSpec((Dl, K * Dl), lambda i: (0, 0)),
            pl.BlockSpec((K * Dl, K), lambda i: (0, 0)),
            pl.BlockSpec((NBB * Q, K * Dl), lambda i: (0, 0)),
            pl.BlockSpec((NBB * Q, 1), lambda i: (0, 0)),
            pl.BlockSpec((NBB, NBB * Q), lambda i: (0, 0)),
            pl.BlockSpec((Dl, P * Dl), lambda i: (0, 0)),
            pl.BlockSpec((Bn, P * Dl), lambda i: (0, 0)),
            pl.BlockSpec((P * Dl, P), lambda i: (0, 0)),
        ],
        out_specs=pl.BlockSpec((OUT_ROWS, OUT_W), lambda i: (0, 0)),
    )

    out = pl.pallas_call(
        kernel,
        out_shape=jax.ShapeDtypeStruct((OUT_ROWS, OUT_W), jnp.float32),
        grid_spec=grid_spec,
        compiler_params=pltpu.CompilerParams(
            dimension_semantics=("arbitrary",)),
    )(q_all, d_all, mu_row, c_row, mu_col, c_col, repmat, ksum,
      dmK, invdl_col, qselT, pool_cat.astype(jnp.float32), dmt, segP)

    # cheap host-side unpack of the packed slab
    sum_k = out[0:NBB, 0:K].reshape(NB_, Bn, K)
    mean_k = out[0:NBB, K:2 * K].reshape(NB_, Bn, K)
    prox_summed = jnp.stack(
        [out[0:K, 2 * K + b * P:2 * K + (b + 1) * P].T for b in range(Bn)],
        axis=0)                                                  # (Bn, P, K)
    return sum_k, mean_k, prox_summed


def build_prox_pool_cat(Dl, prox_range, scaler):
    """(D, P*D) matrix: column i*D+j = avg window of width prox_range[i]
    starting at j (right-zero-padded, matching AvgPool1d + F.pad), scaled by
    scaler[i]."""
    P = len(prox_range)
    mats = np.zeros((Dl, P * Dl), np.float32)
    for i, w in enumerate(prox_range):
        for j in range(Dl - w + 1):
            mats[j:j + w, i * Dl + j] = float(scaler[i]) / float(w)
    return jnp.asarray(mats)


# ---------------------------------------------------------------------------
# plain-JAX glue: StackedSelfAttentionEncoder (AllenNLP, 1 layer, dropout=0)
# ---------------------------------------------------------------------------
def add_positional_features(x):
    _, L, E = x.shape
    num_ts = E // 2
    ts_range = jnp.arange(num_ts, dtype=jnp.float32)
    log_inc = math.log(1.0e4) / (num_ts - 1)
    inv = jnp.exp(ts_range * -log_inc)
    pos = jnp.arange(L, dtype=jnp.float32)
    scaled = pos[:, None] * inv[None, :]
    sinus = jnp.concatenate([jnp.sin(scaled), jnp.cos(scaled)], axis=1)
    if E % 2 != 0:
        sinus = jnp.concatenate([sinus, jnp.zeros((L, 1), jnp.float32)], axis=1)
    return x + sinus[None]


def layer_norm(x, g, b, eps=1e-6):
    mean = jnp.mean(x, axis=-1, keepdims=True)
    std = jnp.sqrt(jnp.mean((x - mean) ** 2, axis=-1, keepdims=True))
    return g * (x - mean) / (std + eps) + b


def multihead_self_attention(x, mask, p):
    Bn, L, E = x.shape
    H, A, V = HEADS, PROJ, PROJ
    comb = x @ p['att_qkv_w'].T + p['att_qkv_b']
    q, k, v = comb[..., :A], comb[..., A:2 * A], comb[..., 2 * A:]
    scale = float(E // H) ** 0.5
    dq, dv = A // H, V // H
    qh = q.reshape(Bn, L, H, dq).transpose(0, 2, 1, 3)
    kh = k.reshape(Bn, L, H, dq).transpose(0, 2, 1, 3)
    vh = v.reshape(Bn, L, H, dv).transpose(0, 2, 1, 3)
    sims = jnp.einsum('bhqd,bhkd->bhqk', qh / scale, kh)
    m = mask[:, None, None, :].astype(sims.dtype)
    att = jax.nn.softmax(sims * m, axis=-1)          # AllenNLP masked_softmax
    att = att * m
    att = att / (jnp.sum(att, axis=-1, keepdims=True) + 1e-13)
    out = jnp.einsum('bhqk,bhkd->bhqd', att, vh)
    out = out.transpose(0, 2, 1, 3).reshape(Bn, L, V)
    return out @ p['att_out_w'].T + p['att_out_b']


def stacked_self_attention(x, mask, p):
    x = add_positional_features(x)
    cached = x
    h = jnp.maximum(x @ p['ff_w1'].T + p['ff_b1'], 0.0)
    ff = h @ p['ff_w2'].T + p['ff_b2']
    ff = layer_norm(ff + cached, p['ff_ln_g'], p['ff_ln_b'])
    att = multihead_self_attention(ff, mask, p)
    return layer_norm(att + ff, p['ln_g'], p['ln_b'])


def ngram_representation(x, W, b, n):
    """ConstantPad1d((0,n-1)) + Conv1d(E->CONV_OUT,k=n) + ReLU, in NLC layout."""
    Bn, L, _ = x.shape
    C = W.shape[0]
    xp = jnp.pad(x, ((0, 0), (0, n - 1), (0, 0)))
    acc = jnp.zeros((Bn, L, C), jnp.float32)
    for j in range(n):
        acc = acc + jnp.einsum('ble,ce->blc', xp[:, j:j + L, :], W[:, :, j])
    return jnp.maximum(acc + b, 0.0)


# ---------------------------------------------------------------------------
# deterministic parameter init (shapes from __init__; synthetic values)
# ---------------------------------------------------------------------------
def init_params(key):
    E = EMB
    keys = iter(jax.random.split(key, 40))

    def unif(shape, fan_in):
        bound = 1.0 / math.sqrt(fan_in)
        return jax.random.uniform(next(keys), shape, jnp.float32, -bound, bound)

    p = {}
    # shared StackedSelfAttentionEncoder
    p['ff_w1'] = unif((FF_HID, E), E);            p['ff_b1'] = unif((FF_HID,), E)
    p['ff_w2'] = unif((E, FF_HID), FF_HID);       p['ff_b2'] = unif((E,), FF_HID)
    p['ff_ln_g'] = jnp.ones((E,), jnp.float32);   p['ff_ln_b'] = jnp.zeros((E,), jnp.float32)
    p['att_qkv_w'] = unif((3 * PROJ, E), E);      p['att_qkv_b'] = unif((3 * PROJ,), E)
    p['att_out_w'] = unif((E, PROJ), PROJ);       p['att_out_b'] = unif((E,), PROJ)
    p['ln_g'] = jnp.ones((E,), jnp.float32);      p['ln_b'] = jnp.zeros((E,), jnp.float32)
    # gaussian kernels
    p['mu'] = jnp.array(kernel_mus(K_KERNELS), jnp.float32)
    p['sigma'] = jnp.array(kernel_sigmas(K_KERNELS), jnp.float32)
    # proximity branch
    p['prox_scaler'] = jnp.array(PROX_RANGE, jnp.float32)
    p['prox_lin_w'] = unif((len(PROX_RANGE), K_KERNELS), K_KERNELS)
    p['prox_lin_b'] = unif((len(PROX_RANGE),), K_KERNELS)
    p['prox_comb_w'] = unif((1, len(PROX_RANGE)), len(PROX_RANGE))
    p['prox_comb_b'] = unif((1,), len(PROX_RANGE))
    # n-gram convs
    p['conv_w'], p['conv_b'] = [], []
    for n in NGRAMS:
        fan = EMB * n
        p['conv_w'].append(unif((CONV_OUT, EMB, n), fan))
        p['conv_b'].append(unif((CONV_OUT,), fan))
    # final linears
    nk3 = K_KERNELS * len(NGRAMS)
    p['linear_sum_w'] = unif((1, nk3), nk3);                p['linear_sum_b'] = unif((1,), nk3)
    p['linear_mean_w'] = unif((1, nk3), nk3);               p['linear_mean_b'] = unif((1,), nk3)
    p['linear_oto_sum_w'] = unif((1, K_KERNELS), K_KERNELS); p['linear_oto_sum_b'] = unif((1,), K_KERNELS)
    p['linear_oto_mean_w'] = unif((1, K_KERNELS), K_KERNELS); p['linear_oto_mean_b'] = unif((1,), K_KERNELS)
    p['linear_comb_w'] = unif((1, 5), 5)                    # bias=False
    return p


# ---------------------------------------------------------------------------
# full forward pass
# ---------------------------------------------------------------------------
def matchmaker_forward(p, pool_cat, q_emb, d_emb, q_mask, d_mask):
    # contextualized representations + concat with raw embeddings
    q_ctx = stacked_self_attention(q_emb, q_mask, p)
    d_ctx = stacked_self_attention(d_emb, d_mask, p)
    q_cat = jnp.concatenate([q_emb, q_ctx], axis=2)
    d_cat = jnp.concatenate([d_emb, d_ctx], axis=2)

    # build the 4 branches: one-to-one + 3 n-gram conv representations
    q_branches = [q_cat]
    d_branches = [d_cat]
    for idx, n in enumerate(NGRAMS):
        q_branches.append(ngram_representation(q_emb, p['conv_w'][idx], p['conv_b'][idx], n))
        d_branches.append(ngram_representation(d_emb, p['conv_w'][idx], p['conv_b'][idx], n))

    # pad feature dims to a common multiple of 128 (cosine is zero-pad invariant)
    e_pad = max(x.shape[-1] for x in q_branches)
    e_pad = ((e_pad + 127) // 128) * 128

    def pad_e(x):
        return jnp.pad(x, ((0, 0), (0, 0), (0, e_pad - x.shape[-1])))

    q_stack = jnp.stack([pad_e(x) for x in q_branches])     # (4, B, Q, e_pad)
    d_stack = jnp.stack([pad_e(x) for x in d_branches])     # (4, B, D, e_pad)

    # single fused Pallas call: all kernel pooling + proximity pooling
    sum_k, mean_k, prox_summed = fused_kernel_pool(
        q_stack, d_stack, q_mask, d_mask, p['mu'], p['sigma'], pool_cat)

    oto_sum, oto_mean = sum_k[0], mean_k[0]                              # (B, K)
    ngram_sum = jnp.concatenate([sum_k[i] for i in range(1, 1 + len(NGRAMS))], axis=1)
    ngram_mean = jnp.concatenate([mean_k[i] for i in range(1, 1 + len(NGRAMS))], axis=1)

    # proximity head
    prox_lin = jnp.einsum('bik,ik->bi', prox_summed, p['prox_lin_w']) + p['prox_lin_b']
    prox_out = prox_lin @ p['prox_comb_w'].T + p['prox_comb_b']          # (B, 1)

    # final combination
    oto_sum_out = oto_sum @ p['linear_oto_sum_w'].T + p['linear_oto_sum_b']
    oto_mean_out = oto_mean @ p['linear_oto_mean_w'].T + p['linear_oto_mean_b']
    sum_out = ngram_sum @ p['linear_sum_w'].T + p['linear_sum_b']
    mean_out = ngram_mean @ p['linear_mean_w'].T + p['linear_mean_b']
    comb = jnp.concatenate([oto_sum_out, oto_mean_out, sum_out, mean_out, prox_out], axis=1)
    score = (comb @ p['linear_comb_w'].T)[:, 0]
    return score


# ---------------------------------------------------------------------------
if __name__ == "__main__":
    key = jax.random.PRNGKey(0)
    kq, kd, kp = jax.random.split(key, 3)

    query_embeddings = jax.random.normal(kq, (B, QLEN, EMB), jnp.float32)
    document_embeddings = jax.random.normal(kd, (B, DLEN, EMB), jnp.float32)
    q_lens = jnp.array([6, 8])
    d_lens = jnp.array([16, 13])
    query_pad_oov_mask = (jnp.arange(QLEN)[None, :] < q_lens[:, None]).astype(jnp.float32)
    document_pad_oov_mask = (jnp.arange(DLEN)[None, :] < d_lens[:, None]).astype(jnp.float32)

    params = init_params(kp)
    pool_cat = build_prox_pool_cat(DLEN, PROX_RANGE, np.asarray(params['prox_scaler']))

    fwd = jax.jit(matchmaker_forward)
    score = fwd(params, pool_cat,
                query_embeddings, document_embeddings,
                query_pad_oov_mask, document_pad_oov_mask)
    score = jax.block_until_ready(score)
    assert score.shape == (B,)
    assert bool(jnp.all(jnp.isfinite(score)))
    print("KERNEL_OK")
</pallas_src>

<mosaic_0001>
module attributes {stable_mosaic.version = 11 : i64} {
  func.func @_fused_pool_body(%arg0: i32, %arg1: memref<8x8x384xf32, #tpu.memory_space<vmem>>, %arg2: memref<8x16x384xf32, #tpu.memory_space<vmem>>, %arg3: memref<1x176xf32, #tpu.memory_space<vmem>>, %arg4: memref<1x176xf32, #tpu.memory_space<vmem>>, %arg5: memref<11x1xf32, #tpu.memory_space<vmem>>, %arg6: memref<11x1xf32, #tpu.memory_space<vmem>>, %arg7: memref<16x176xf32, #tpu.memory_space<vmem>>, %arg8: memref<176x11xf32, #tpu.memory_space<vmem>>, %arg9: memref<64x176xf32, #tpu.memory_space<vmem>>, %arg10: memref<64x1xf32, #tpu.memory_space<vmem>>, %arg11: memref<8x64xf32, #tpu.memory_space<vmem>>, %arg12: memref<16x192xf32, #tpu.memory_space<vmem>>, %arg13: memref<2x192xf32, #tpu.memory_space<vmem>>, %arg14: memref<192x12xf32, #tpu.memory_space<vmem>>, %arg15: memref<16x128xf32, #tpu.memory_space<vmem>>) attributes {dimension_semantics = [#tpu.dimension_semantics<arbitrary>], iteration_bounds = array<i64: 1>, scalar_prefetch = 0 : i64, scratch_operands = 0 : i64, tpu.core_type = #tpu.core_type<tc>, window_params = [{pipeline_mode = #tpu.pipeline_mode<synchronous>, transform_indices = @transform_0, window_bounds = array<i64: 8, 8, 384>}, {pipeline_mode = #tpu.pipeline_mode<synchronous>, transform_indices = @transform_1, window_bounds = array<i64: 8, 16, 384>}, {pipeline_mode = #tpu.pipeline_mode<synchronous>, transform_indices = @transform_2, window_bounds = array<i64: 1, 176>}, {pipeline_mode = #tpu.pipeline_mode<synchronous>, transform_indices = @transform_3, window_bounds = array<i64: 1, 176>}, {pipeline_mode = #tpu.pipeline_mode<synchronous>, transform_indices = @transform_4, window_bounds = array<i64: 11, 1>}, {pipeline_mode = #tpu.pipeline_mode<synchronous>, transform_indices = @transform_5, window_bounds = array<i64: 11, 1>}, {pipeline_mode = #tpu.pipeline_mode<synchronous>, transform_indices = @transform_6, window_bounds = array<i64: 16, 176>}, {pipeline_mode = #tpu.pipeline_mode<synchronous>, transform_indices = @transform_7, window_bounds = array<i64: 176, 11>}, {pipeline_mode = #tpu.pipeline_mode<synchronous>, transform_indices = @transform_8, window_bounds = array<i64: 64, 176>}, {pipeline_mode = #tpu.pipeline_mode<synchronous>, transform_indices = @transform_9, window_bounds = array<i64: 64, 1>}, {pipeline_mode = #tpu.pipeline_mode<synchronous>, transform_indices = @transform_10, window_bounds = array<i64: 8, 64>}, {pipeline_mode = #tpu.pipeline_mode<synchronous>, transform_indices = @transform_11, window_bounds = array<i64: 16, 192>}, {pipeline_mode = #tpu.pipeline_mode<synchronous>, transform_indices = @transform_12, window_bounds = array<i64: 2, 192>}, {pipeline_mode = #tpu.pipeline_mode<synchronous>, transform_indices = @transform_13, window_bounds = array<i64: 192, 12>}, {pipeline_mode = #tpu.pipeline_mode<synchronous>, transform_indices = @transform_14, window_bounds = array<i64: 16, 128>}]} {
    %c0 = arith.constant 0 : index
    %c0_0 = arith.constant 0 : index
    %c0_1 = arith.constant 0 : index
    %0 = vector.load %arg1[%c0, %c0_0, %c0_1] : memref<8x8x384xf32, #tpu.memory_space<vmem>>, vector<8x8x384xf32>
    %c0_2 = arith.constant 0 : index
    %c0_3 = arith.constant 0 : index
    %c0_4 = arith.constant 0 : index
    %1 = vector.load %arg2[%c0_2, %c0_3, %c0_4] : memref<8x16x384xf32, #tpu.memory_space<vmem>>, vector<8x16x384xf32>
    %2 = arith.mulf %0, %0 : vector<8x8x384xf32>
    %cst = arith.constant dense<0.000000e+00> : vector<8x8xf32>
    %3 = vector.multi_reduction <add>, %2, %cst [2] : vector<8x8x384xf32> to vector<8x8xf32>
    %4 = vector.shape_cast %3 : vector<8x8xf32> to vector<8x8x1xf32>
    %cst_5 = arith.constant 9.99999988E-27 : f32
    %5 = vector.broadcast %cst_5 : f32 to vector<8x8x1xf32>
    %6 = arith.addf %4, %5 : vector<8x8x1xf32>
    %7 = math.rsqrt %6 : vector<8x8x1xf32>
    %8 = vector.broadcast %7 : vector<8x8x1xf32> to vector<8x8x384xf32>
    %9 = arith.mulf %0, %8 : vector<8x8x384xf32>
    %10 = arith.mulf %1, %1 : vector<8x16x384xf32>
    %cst_6 = arith.constant dense<0.000000e+00> : vector<8x16xf32>
    %11 = vector.multi_reduction <add>, %10, %cst_6 [2] : vector<8x16x384xf32> to vector<8x16xf32>
    %12 = vector.shape_cast %11 : vector<8x16xf32> to vector<8x16x1xf32>
    %cst_7 = arith.constant 9.99999988E-27 : f32
    %13 = vector.broadcast %cst_7 : f32 to vector<8x16x1xf32>
    %14 = arith.addf %12, %13 : vector<8x16x1xf32>
    %15 = math.rsqrt %14 : vector<8x16x1xf32>
    %16 = vector.broadcast %15 : vector<8x16x1xf32> to vector<8x16x384xf32>
    %17 = arith.mulf %1, %16 : vector<8x16x384xf32>
    %18 = arith.truncf %9 : vector<8x8x384xf32> to vector<8x8x384xbf16>
    %19 = arith.truncf %17 : vector<8x16x384xf32> to vector<8x16x384xbf16>
    "tpu.trace_start"() <{level = 10 : i32, message = "bqe,bke->bqk"}> : () -> ()
    %cst_8 = arith.constant dense<0.000000e+00> : vector<8x8x16xf32>
    %20 = tpu.matmul %18, %19, %cst_8 {dimension_numbers = #tpu.dot_dimension_numbers<[2], [2], [1], [1], [0, 0, 0, 1, 1, 1], [0], [0]>} : vector<8x8x384xbf16>, vector<8x16x384xbf16>, vector<8x8x16xf32> -> vector<8x8x16xf32>
    "tpu.trace_stop"() : () -> ()
    %21 = vector.shape_cast %20 : vector<8x8x16xf32> to vector<64x16xf32>
    %c0_9 = arith.constant 0 : index
    %c0_10 = arith.constant 0 : index
    %22 = vector.load %arg7[%c0_9, %c0_10] : memref<16x176xf32, #tpu.memory_space<vmem>>, vector<16x176xf32>
    %cst_11 = arith.constant dense<0.000000e+00> : vector<64x176xf32>
    %23 = tpu.matmul %21, %22, %cst_11 {dimension_numbers = #tpu.dot_dimension_numbers<[1], [0], [0], [1], [0, 0, 1, 1], [], []>} : vector<64x16xf32>, vector<16x176xf32>, vector<64x176xf32> -> vector<64x176xf32>
    %c0_12 = arith.constant 0 : index
    %c0_13 = arith.constant 0 : index
    %24 = vector.load %arg3[%c0_12, %c0_13] : memref<1x176xf32, #tpu.memory_space<vmem>>, vector<1x176xf32>
    %25 = vector.broadcast %24 : vector<1x176xf32> to vector<64x176xf32>
    %26 = arith.subf %23, %25 : vector<64x176xf32>
    %27 = arith.mulf %26, %26 : vector<64x176xf32>
    %c0_14 = arith.constant 0 : index
    %c0_15 = arith.constant 0 : index
    %28 = vector.load %arg4[%c0_14, %c0_15] : memref<1x176xf32, #tpu.memory_space<vmem>>, vector<1x176xf32>
    %29 = vector.broadcast %28 : vector<1x176xf32> to vector<64x176xf32>
    %30 = arith.mulf %27, %29 : vector<64x176xf32>
    %31 = math.exp %30 : vector<64x176xf32>
    %c0_16 = arith.constant 0 : index
    %c0_17 = arith.constant 0 : index
    %32 = vector.load %arg9[%c0_16, %c0_17] : memref<64x176xf32, #tpu.memory_space<vmem>>, vector<64x176xf32>
    %33 = arith.mulf %31, %32 : vector<64x176xf32>
    %c0_18 = arith.constant 0 : index
    %c0_19 = arith.constant 0 : index
    %34 = vector.load %arg8[%c0_18, %c0_19] : memref<176x11xf32, #tpu.memory_space<vmem>>, vector<176x11xf32>
    %cst_20 = arith.constant dense<0.000000e+00> : vector<64x11xf32>
    %35 = tpu.matmul %33, %34, %cst_20 {dimension_numbers = #tpu.dot_dimension_numbers<[1], [0], [0], [1], [0, 0, 1, 1], [], []>} : vector<64x176xf32>, vector<176x11xf32>, vector<64x11xf32> -> vector<64x11xf32>
    %cst_21 = arith.constant 1.000000e-10 : f32
    %36 = vector.broadcast %cst_21 : f32 to vector<64x11xf32>
    %37 = arith.maximumf %35, %36 : vector<64x11xf32>
    %38 = math.log %37 : vector<64x11xf32>
    %c0_22 = arith.constant 0 : index
    %c0_23 = arith.constant 0 : index
    %39 = vector.load %arg10[%c0_22, %c0_23] : memref<64x1xf32, #tpu.memory_space<vmem>>, vector<64x1xf32>
    %40 = vector.broadcast %39 : vector<64x1xf32> to vector<64x11xf32>
    %41 = arith.mulf %35, %40 : vector<64x11xf32>
    %cst_24 = arith.constant 1.000000e-10 : f32
    %42 = vector.broadcast %cst_24 : f32 to vector<64x11xf32>
    %43 = arith.maximumf %41, %42 : vector<64x11xf32>
    %44 = math.log %43 : vector<64x11xf32>
    %c0_25 = arith.constant 0 : index
    %c0_26 = arith.constant 0 : index
    %45 = vector.load %arg11[%c0_25, %c0_26] : memref<8x64xf32, #tpu.memory_space<vmem>>, vector<8x64xf32>
    %cst_27 = arith.constant dense<0.000000e+00> : vector<8x11xf32>
    %46 = tpu.matmul %45, %38, %cst_27 {dimension_numbers = #tpu.dot_dimension_numbers<[1], [0], [0], [1], [0, 0, 1, 1], [], []>} : vector<8x64xf32>, vector<64x11xf32>, vector<8x11xf32> -> vector<8x11xf32>
    %cst_28 = arith.constant dense<0.000000e+00> : vector<8x11xf32>
    %47 = tpu.matmul %45, %44, %cst_28 {dimension_numbers = #tpu.dot_dimension_numbers<[1], [0], [0], [1], [0, 0, 1, 1], [], []>} : vector<8x64xf32>, vector<64x11xf32>, vector<8x11xf32> -> vector<8x11xf32>
    %c0_29 = arith.constant 0 : index
    %c0_30 = arith.constant 0 : index
    %48 = vector.load %arg5[%c0_29, %c0_30] : memref<11x1xf32, #tpu.memory_space<vmem>>, vector<11x1xf32>
    %c0_31 = arith.constant 0 : index
    %c0_32 = arith.constant 0 : index
    %49 = vector.load %arg6[%c0_31, %c0_32] : memref<11x1xf32, #tpu.memory_space<vmem>>, vector<11x1xf32>
    %50 = vector.extract_strided_slice %20 {offsets = [0, 0, 0], sizes = [2, 8, 16], strides = [1, 1, 1]} : vector<8x8x16xf32> to vector<2x8x16xf32>
    %cst_33 = arith.constant dense<0xFF800000> : vector<2x16xf32>
    %51 = vector.multi_reduction <maximumf>, %50, %cst_33 [1] : vector<2x8x16xf32> to vector<2x16xf32>
    %c0_34 = arith.constant 0 : index
    %c0_35 = arith.constant 0 : index
    %52 = vector.load %arg12[%c0_34, %c0_35] : memref<16x192xf32, #tpu.memory_space<vmem>>, vector<16x192xf32>
    %cst_36 = arith.constant dense<0.000000e+00> : vector<2x192xf32>
    %53 = tpu.matmul %51, %52, %cst_36 {dimension_numbers = #tpu.dot_dimension_numbers<[1], [0], [0], [1], [0, 0, 1, 1], [], []>} : vector<2x16xf32>, vector<16x192xf32>, vector<2x192xf32> -> vector<2x192xf32>
    %cst_37 = arith.constant 0.000000e+00 : f32
    %54 = vector.broadcast %cst_37 : f32 to vector<16x128xf32>
    %c0_38 = arith.constant 0 : index
    %c0_39 = arith.constant 0 : index
    %55 = vector.load %arg15[%c0_38, %c0_39] : memref<16x128xf32, #tpu.memory_space<vmem>>, vector<16x128xf32>
    tpu.vector_store %arg15[%c0_38, %c0_39], %54 {strides = array<i32>} : memref<16x128xf32, #tpu.memory_space<vmem>>, vector<16x128xf32>,
    %c0_40 = arith.constant 0 : index
    %c0_41 = arith.constant 0 : index
    %56 = vector.load %arg15[%c0_40, %c0_41] : memref<16x128xf32, #tpu.memory_space<vmem>>, vector<8x11xf32>
    tpu.vector_store %arg15[%c0_40, %c0_41], %46 {strides = array<i32>} : memref<16x128xf32, #tpu.memory_space<vmem>>, vector<8x11xf32>,
    %c0_42 = arith.constant 0 : index
    %c11 = arith.constant 11 : index
    %57 = vector.load %arg15[%c0_42, %c11] : memref<16x128xf32, #tpu.memory_space<vmem>>, vector<8x11xf32>
    tpu.vector_store %arg15[%c0_42, %c11], %47 {strides = array<i32>} : memref<16x128xf32, #tpu.memory_space<vmem>>, vector<8x11xf32>,
    %58 = vector.extract_strided_slice %53 {offsets = [0, 0], sizes = [1, 192], strides = [1, 1]} : vector<2x192xf32> to vector<1x192xf32>
    %59 = vector.broadcast %58 : vector<1x192xf32> to vector<11x192xf32>
    %60 = vector.broadcast %48 : vector<11x1xf32> to vector<11x192xf32>
    %61 = arith.subf %59, %60 : vector<11x192xf32>
    %62 = arith.mulf %61, %61 : vector<11x192xf32>
    %63 = vector.broadcast %49 : vector<11x1xf32> to vector<11x192xf32>
    %64 = arith.mulf %62, %63 : vector<11x192xf32>
    %65 = math.exp %64 : vector<11x192xf32>
    %c0_43 = arith.constant 0 : index
    %c0_44 = arith.constant 0 : index
    %66 = vector.load %arg13[%c0_43, %c0_44] : memref<2x192xf32, #tpu.memory_space<vmem>>, vector<1x192xf32>
    %67 = vector.broadcast %66 : vector<1x192xf32> to vector<11x192xf32>
    %68 = arith.mulf %65, %67 : vector<11x192xf32>
    %c0_45 = arith.constant 0 : index
    %c0_46 = arith.constant 0 : index
    %69 = vector.load %arg14[%c0_45, %c0_46] : memref<192x12xf32, #tpu.memory_space<vmem>>, vector<192x12xf32>
    %cst_47 = arith.constant dense<0.000000e+00> : vector<11x12xf32>
    %70 = tpu.matmul %68, %69, %cst_47 {dimension_numbers = #tpu.dot_dimension_numbers<[1], [0], [0], [1], [0, 0, 1, 1], [], []>} : vector<11x192xf32>, vector<192x12xf32>, vector<11x12xf32> -> vector<11x12xf32>
    %c0_48 = arith.constant 0 : index
    %c22 = arith.constant 22 : index
    %71 = vector.load %arg15[%c0_48, %c22] : memref<16x128xf32, #tpu.memory_space<vmem>>, vector<11x12xf32>
    tpu.vector_store %arg15[%c0_48, %c22], %70 {strides = array<i32>} : memref<16x128xf32, #tpu.memory_space<vmem>>, vector<11x12xf32>,
    %72 = vector.extract_strided_slice %53 {offsets = [1, 0], sizes = [1, 192], strides = [1, 1]} : vector<2x192xf32> to vector<1x192xf32>
    %73 = vector.broadcast %72 : vector<1x192xf32> to vector<11x192xf32>
    %74 = vector.broadcast %48 : vector<11x1xf32> to vector<11x192xf32>
    %75 = arith.subf %73, %74 : vector<11x192xf32>
    %76 = arith.mulf %75, %75 : vector<11x192xf32>
    %77 = vector.broadcast %49 : vector<11x1xf32> to vector<11x192xf32>
    %78 = arith.mulf %76, %77 : vector<11x192xf32>
    %79 = math.exp %78 : vector<11x192xf32>
    %c1 = arith.constant 1 : index
    %c0_49 = arith.constant 0 : index
    %80 = vector.load %arg13[%c1, %c0_49] : memref<2x192xf32, #tpu.memory_space<vmem>>, vector<1x192xf32>
    %81 = vector.broadcast %80 : vector<1x192xf32> to vector<11x192xf32>
    %82 = arith.mulf %79, %81 : vector<11x192xf32>
    %c0_50 = arith.constant 0 : index
    %c0_51 = arith.constant 0 : index
    %83 = vector.load %arg14[%c0_50, %c0_51] : memref<192x12xf32, #tpu.memory_space<vmem>>, vector<192x12xf32>
    %cst_52 = arith.constant dense<0.000000e+00> : vector<11x12xf32>
    %84 = tpu.matmul %82, %83, %cst_52 {dimension_numbers = #tpu.dot_dimension_numbers<[1], [0], [0], [1], [0, 0, 1, 1], [], []>} : vector<11x192xf32>, vector<192x12xf32>, vector<11x12xf32> -> vector<11x12xf32>
    %c0_53 = arith.constant 0 : index
    %c34 = arith.constant 34 : index
    %85 = vector.load %arg15[%c0_53, %c34] : memref<16x128xf32, #tpu.memory_space<vmem>>, vector<11x12xf32>
    tpu.vector_store %arg15[%c0_53, %c34], %84 {strides = array<i32>} : memref<16x128xf32, #tpu.memory_space<vmem>>, vector<11x12xf32>,
    return
  }
  func.func @transform_0(%arg0: i32) -> (i32, i32, i32) {
    %c0_i32 = arith.constant 0 : i32
    %c0_i32_0 = arith.constant 0 : i32
    %c0_i32_1 = arith.constant 0 : i32
    %c0_i32_2 = arith.constant 0 : i32
    return %c0_i32, %c0_i32_0, %c0_i32_1 : i32, i32, i32
  }
  func.func @transform_1(%arg0: i32) -> (i32, i32, i32) {
    %c0_i32 = arith.constant 0 : i32
    %c0_i32_0 = arith.constant 0 : i32
    %c0_i32_1 = arith.constant 0 : i32
    %c0_i32_2 = arith.constant 0 : i32
    return %c0_i32, %c0_i32_0, %c0_i32_1 : i32, i32, i32
  }
  func.func @transform_2(%arg0: i32) -> (i32, i32) {
    %c0_i32 = arith.constant 0 : i32
    %c0_i32_0 = arith.constant 0 : i32
    %c0_i32_1 = arith.constant 0 : i32
    return %c0_i32, %c0_i32_0 : i32, i32
  }
  func.func @transform_3(%arg0: i32) -> (i32, i32) {
    %c0_i32 = arith.constant 0 : i32
    %c0_i32_0 = arith.constant 0 : i32
    %c0_i32_1 = arith.constant 0 : i32
    return %c0_i32, %c0_i32_0 : i32, i32
  }
  func.func @transform_4(%arg0: i32) -> (i32, i32) {
    %c0_i32 = arith.constant 0 : i32
    %c0_i32_0 = arith.constant 0 : i32
    %c0_i32_1 = arith.constant 0 : i32
    return %c0_i32, %c0_i32_0 : i32, i32
  }
  func.func @transform_5(%arg0: i32) -> (i32, i32) {
    %c0_i32 = arith.constant 0 : i32
    %c0_i32_0 = arith.constant 0 : i32
    %c0_i32_1 = arith.constant 0 : i32
    return %c0_i32, %c0_i32_0 : i32, i32
  }
  func.func @transform_6(%arg0: i32) -> (i32, i32) {
    %c0_i32 = arith.constant 0 : i32
    %c0_i32_0 = arith.constant 0 : i32
    %c0_i32_1 = arith.constant 0 : i32
    return %c0_i32, %c0_i32_0 : i32, i32
  }
  func.func @transform_7(%arg0: i32) -> (i32, i32) {
    %c0_i32 = arith.constant 0 : i32
    %c0_i32_0 = arith.constant 0 : i32
    %c0_i32_1 = arith.constant 0 : i32
    return %c0_i32, %c0_i32_0 : i32, i32
  }
  func.func @transform_8(%arg0: i32) -> (i32, i32) {
    %c0_i32 = arith.constant 0 : i32
    %c0_i32_0 = arith.constant 0 : i32
    %c0_i32_1 = arith.constant 0 : i32
    return %c0_i32, %c0_i32_0 : i32, i32
  }
  func.func @transform_9(%arg0: i32) -> (i32, i32) {
    %c0_i32 = arith.constant 0 : i32
    %c0_i32_0 = arith.constant 0 : i32
    %c0_i32_1 = arith.constant 0 : i32
    return %c0_i32, %c0_i32_0 : i32, i32
  }
  func.func @transform_10(%arg0: i32) -> (i32, i32) {
    %c0_i32 = arith.constant 0 : i32
    %c0_i32_0 = arith.constant 0 : i32
    %c0_i32_1 = arith.constant 0 : i32
    return %c0_i32, %c0_i32_0 : i32, i32
  }
  func.func @transform_11(%arg0: i32) -> (i32, i32) {
    %c0_i32 = arith.constant 0 : i32
    %c0_i32_0 = arith.constant 0 : i32
    %c0_i32_1 = arith.constant 0 : i32
    return %c0_i32, %c0_i32_0 : i32, i32
  }
  func.func @transform_12(%arg0: i32) -> (i32, i32) {
    %c0_i32 = arith.constant 0 : i32
    %c0_i32_0 = arith.constant 0 : i32
    %c0_i32_1 = arith.constant 0 : i32
    return %c0_i32, %c0_i32_0 : i32, i32
  }
  func.func @transform_13(%arg0: i32) -> (i32, i32) {
    %c0_i32 = arith.constant 0 : i32
    %c0_i32_0 = arith.constant 0 : i32
    %c0_i32_1 = arith.constant 0 : i32
    return %c0_i32, %c0_i32_0 : i32, i32
  }
  func.func @transform_14(%arg0: i32) -> (i32, i32) {
    %c0_i32 = arith.constant 0 : i32
    %c0_i32_0 = arith.constant 0 : i32
    %c0_i32_1 = arith.constant 0 : i32
    return %c0_i32, %c0_i32_0 : i32, i32
  }
}

</mosaic_0001>

<bundles_post_ra>
// kernel: tile.26
= control target key start
LH: loop header
LB: loop body
LE: loop exit
PB: predicated region body
PF: predicated region fallthrough
CT: control target
= control target key end

     0   :  { %s8_s6 = smov 3  ;;  %s22_s9 = smov 3  ;;  %vm48_vm0 = vcmask 1043458   ;;  %vm3_vm1 = vcmask 130048   ;;  %vm12_vm2 = vcmask 1048448   ;;  %vm19_vm3 = vcmask 917248   ;;  %s156_s0 = inlined_call_operand.vmem [shape: f32[2,11,16], index: 0, kind: input, shape index: {}]   ;;  %s157_s1 = inlined_call_operand.vmem [shape: f32[2,176], index: 1, kind: output, shape index: {}]  }
   0x1   :  { %v84_v0 = vld [vmem:[%s156_s0 + $0x7] ss:$16 sm:%s8_s6]   ;;  %s101_s10 = smov 112   ;;  %v86_v1 = vld [vmem:[%s156_s0 + $0x5] ss:$16 sm:%s22_s9]   ;;  %s15_s13 = smov 3 }
   0x2   :  { %10 = vrot.lane.b32.xlu0 %v84_v0, %s101_s10  ;;  %s102_s14 = smov 80   ;;  %v85_v2 = vld [vmem:[%s156_s0 + $0x6] ss:$16 sm:%s15_s13]   ;;  %s29_s17 = smov 3  ;;  %vm26_vm4 = vcmask 786048   ;;  %vm33_vm5 = vcmask 654848  }
   0x3   :  { %24 = vrot.lane.b32.xlu1 %v86_v1, %s102_s14  ;;  %v87_v3 = vld [vmem:[%s156_s0 + $0x4] ss:$16 sm:%s29_s17]   ;;  %s36_s20 = smov 3  ;;  %s43_s23 = smov 3  ;;  %vm40_vm6 = vcmask 523648   ;;  %vm52_vm7 = vcmask 392448  }
   0x4   :  { %v88_v4 = vld [vmem:[%s156_s0 + $0x3] ss:$16 sm:%s36_s20]   ;;  %s46_s24 = smov 12  ;;  %s103_s25 = smov 96   ;;  %v89_v5 = vld [vmem:[%s156_s0 + $0x2] ss:$16 sm:%s43_s23]  }
   0x5   :  { %s57_s28 = smov 3  ;;  %s104_s29 = smov 64   ;;  %v90_v6 = vld [vmem:[%s156_s0 - $0x16] ss:$16 sm:%s46_s24]   ;;  %vm66_vm8 = vcmask 261248  }
   0x6   :  { %17 = vrot.lane.b32.xlu0 %v85_v2, %s103_s25  ;;  %s60_s3 = smov 12  ;;  %v49_v7 = vsel %vm48_vm0, %v90_v6, %v89_v5  ;;  %v91_v8 = vld [vmem:[%s156_s0 + $0x1] ss:$16 sm:%s57_s28]   ;;  %v2_v10 = vld [vmem:[%s156_s0] ss:$8 sm:$0xf]  }
   0x7   :  { %31 = vrot.lane.b32.xlu1 %v87_v3, %s104_s29  ;;  %v92_v9 = vld [vmem:[%s156_s0 - $0x17] ss:$16 sm:%s60_s3]   ;;  %s105_s0 = smov 48   ;;  %4 = vst.msk [vmem:[#allocation0] ss:$8 sm:$0x3] %vm3_vm1, %v2_v10  }
   0x8   :  { %6 = vst.msk [vmem:[#allocation0 - $0xf] ss:$8 sm:$0xc] %vm3_vm1, %v2_v10   ;;  %s106_s10 = smov 32   ;;  %v63_v11 = vsel %vm48_vm0, %v92_v9, %v91_v8  ;;  %s107_s11 = smov 16  }
   0xa   :  { %38 = vrot.lane.b32.xlu0 %v88_v4, %s105_s0 }
   0xb   :  { %50 = vrot.lane.b32.xlu1 %v49_v7, %s106_s10 }
   0xe   :  { %64 = vrot.lane.b32.xlu0 %v63_v11, %s107_s11 }
  0x74   :  { %v11_v12 = vpop.permute.xlu0 %10  }
  0x75   :  { %13 = vst.msk [vmem:[#allocation0] sm:$0x3] %vm12_vm2, %v11_v12   ;;  %v25_v13 = vpop.permute.xlu1 %24  }
  0x78   :  { %v18_v14 = vpop.permute.xlu0 %17  }
  0x79   :  { %20 = vst.msk [vmem:[#allocation0] sm:$0x3] %vm19_vm3, %v18_v14   ;;  %v32_v15 = vpop.permute.xlu1 %31  }
  0x7a   :  { %27 = vst.msk [vmem:[#allocation0] sm:$0x3] %vm26_vm4, %v25_v13  }
  0x7b   :  { %34 = vst.msk [vmem:[#allocation0] sm:$0x3] %vm33_vm5, %v32_v15  }
  0x7c   :  { %v39_v16 = vpop.permute.xlu0 %38  }
  0x7d   :  { %41 = vst.msk [vmem:[#allocation0] sm:$0x3] %vm40_vm6, %v39_v16   ;;  %v51_v17 = vpop.permute.xlu1 %50  }
  0x7e   :  { %53 = vst.msk [vmem:[#allocation0] sm:$0x3] %vm52_vm7, %v51_v17   ;;  %55 = vst.msk [vmem:[#allocation0 + $0x6] sm:$0xc] %vm52_vm7, %v51_v17  }
  0x80   :  { %v65_v18 = vpop.permute.xlu0 %64  }
  0x81   :  { %67 = vst.msk [vmem:[#allocation0] sm:$0x3] %vm66_vm8, %v65_v18   ;;  %69 = vst.msk [vmem:[#allocation0 + $0x6] sm:$0xc] %vm66_vm8, %v65_v18  }
  0x88   :  { %v74_v19 = vld [vmem:[#allocation0] sm:$0x3]  ;;  %v79_v20 = vld [vmem:[#allocation0 + $0x8] sm:$0x3] }
  0x89   :  { %77 = vst [vmem:[%s157_s1] sm:$0x3] %v74_v19  ;;  %93 = vst [vmem:[%s157_s1 + $0x2] sm:$0x3] %v79_v20 }

// kernel: tile.32
= control target key start
LH: loop header
LB: loop body
LE: loop exit
PB: predicated region body
PF: predicated region fallthrough
CT: control target
= control target key end

     0   :  { %vm8_vm0 = vcmask 64512   ;;  %vm14_vm1 = vcmask 130112   ;;  %s42_s0 = inlined_call_operand.vmem [shape: f32[2,8], index: 0, kind: input, shape index: {}]   ;;  %s43_s1 = inlined_call_operand.vmem [shape: f32[16], index: 1, kind: output, shape index: {}]  }
   0x1   :  { %v5_v0 = vld [vmem:[%s42_s0] sm:$0x3]  ;;  %s25_s0 = smov 8  }
   0x2   :  { %6 = vst [vmem:[#allocation1] sm:$0x3] %v5_v0 }
   0x9   :  { %v11_v1 = vld [vmem:[#allocation1 + $0x1] sm:$0x1]   ;;  %v7_v2 = vld [vmem:[#allocation1] sm:$0x1]  }
   0xa   :  { %12 = vrot.lane.b32.xlu0 %v11_v1, %s25_s0  ;;  %9 = vst.msk [vmem:[#allocation0] sm:$0x1] %vm8_vm0, %v7_v2  }
  0x7c   :  { %v13_v3 = vpop.permute.xlu0 %12  }
  0x7d   :  { %15 = vst.msk [vmem:[#allocation0] sm:$0x1] %vm14_vm1, %v13_v3  }
  0x84   :  { %v20_v4 = vld [vmem:[#allocation0] sm:$0x1] }
  0x85   :  { %23 = vst [vmem:[%s43_s1] sm:$0x1] %v20_v4 }

// kernel: tile.0
= control target key start
LH: loop header
LB: loop body
LE: loop exit
PB: predicated region body
PF: predicated region fallthrough
CT: control target
= control target key end

     0   :  { %s177_s8 = smov 125   ;;  %s178_s9 = smov 126   ;;  %vm8_vm0 = vcmask 7168   ;;  %s332_s0 = inlined_call_operand.vmem [shape: f32[4,16], index: 0, kind: input, shape index: {}]   ;;  %s333_s1 = inlined_call_operand.vmem [shape: f32[64,1], index: 1, kind: output, shape index: {}]  }
   0x1   :  { %v5_v0 = vld [vmem:[%s332_s0] sm:$0xf]  ;;  %s176_s0 = smov 127   ;;  %s179_s10 = smov 124  }
   0x2   :  { %6 = vst [vmem:[#allocation0] sm:$0xf] %v5_v0  ;;  %s180_s11 = smov 123   ;;  %s181_s12 = smov 122  }
   0x3   :  { %s182_s13 = smov 121   ;;  %s183_s14 = smov 120  }
   0x4   :  { %s184_s19 = smov 119   ;;  %s185_s20 = smov 118  }
   0x5   :  { %s186_s21 = smov 117   ;;  %s187_s22 = smov 116  }
   0x6   :  { %s188_s23 = smov 115   ;;  %s189_s24 = smov 114  }
   0x7   :  { %s190_s25 = smov 113  }
   0x9   :  { %v11_v1 = vld [vmem:[#allocation0] sm:$0xf]  }
   0xa   :  { %v27_v2 = vld [vmem:[#allocation0] sm:$0xf]   ;;  %12 = vrot.lane.b32.xlu0 %v11_v1, %s176_s0 }
   0xb   :  { %28 = vrot.lane.b32.xlu1 %v27_v2, %s177_s8  ;;  %v19_v3 = vld [vmem:[#allocation0] sm:$0xf]  }
   0xc   :  { %v35_v4 = vld [vmem:[#allocation0] sm:$0xf]  }
   0xd   :  { %v43_v5 = vld [vmem:[#allocation0] sm:$0xf]  }
   0xe   :  { %20 = vrot.lane.b32.xlu0 %v19_v3, %s178_s9  ;;  %v51_v6 = vld [vmem:[#allocation0] sm:$0xf]  }
   0xf   :  { %36 = vrot.lane.b32.xlu1 %v35_v4, %s179_s10  ;;  %v59_v7 = vld [vmem:[#allocation0] sm:$0xf]  }
  0x10   :  { %v67_v8 = vld [vmem:[#allocation0] sm:$0xf]  }
  0x11   :  { %v75_v9 = vld [vmem:[#allocation0] sm:$0xf]  }
  0x12   :  { %44 = vrot.lane.b32.xlu0 %v43_v5, %s180_s11  ;;  %v83_v10 = vld [vmem:[#allocation0] sm:$0xf]  }
  0x13   :  { %52 = vrot.lane.b32.xlu1 %v51_v6, %s181_s12  ;;  %v7_v11 = vld [vmem:[#allocation0] sm:$0xf]  }
  0x14   :  { %9 = vst.msk [vmem:[%s333_s1] ss:$16 sm:$0x3] %vm8_vm0, %v7_v11   ;;  %10 = vst.msk [vmem:[%s333_s1] ss:$16 sm:$0xc] %vm8_vm0, %v7_v11  }
  0x15   :  { %v91_v12 = vld [vmem:[#allocation0] sm:$0xf]  }
  0x16   :  { %60 = vrot.lane.b32.xlu0 %v59_v7, %s182_s13  ;;  %v99_v13 = vld [vmem:[#allocation0] sm:$0xf]  }
  0x17   :  { %68 = vrot.lane.b32.xlu1 %v67_v8, %s183_s14  ;;  %v107_v14 = vld [vmem:[#allocation0] sm:$0xf]  }
  0x18   :  { %v115_v15 = vld [vmem:[#allocation0] sm:$0xf]  }
  0x19   :  { %v123_v16 = vld [vmem:[#allocation0] sm:$0xf]  }
  0x1a   :  { %76 = vrot.lane.b32.xlu0 %v75_v9, %s184_s19 }
  0x1b   :  { %84 = vrot.lane.b32.xlu1 %v83_v10, %s185_s20 }
  0x1e   :  { %92 = vrot.lane.b32.xlu0 %v91_v12, %s186_s21 }
  0x1f   :  { %100 = vrot.lane.b32.xlu1 %v99_v13, %s187_s22 }
  0x22   :  { %108 = vrot.lane.b32.xlu0 %v107_v14, %s188_s23 }
  0x23   :  { %116 = vrot.lane.b32.xlu1 %v115_v15, %s189_s24 }
  0x26   :  { %124 = vrot.lane.b32.xlu0 %v123_v16, %s190_s25 }
  0x7c   :  { %v13_v17 = vpop.permute.xlu0 %12  }
  0x7d   :  { %v29_v18 = vpop.permute.xlu1 %28   ;;  %131 = vst.msk [vmem:[%s333_s1 + $0x1] ss:$16 sm:$0x3] %vm8_vm0, %v13_v17   ;;  %132 = vst.msk [vmem:[%s333_s1 + $0x1] ss:$16 sm:$0xc] %vm8_vm0, %v13_v17  }
  0x7e   :  { %135 = vst.msk [vmem:[%s333_s1 + $0x3] ss:$16 sm:$0x3] %vm8_vm0, %v29_v18   ;;  %136 = vst.msk [vmem:[%s333_s1 + $0x3] ss:$16 sm:$0xc] %vm8_vm0, %v29_v18  }
  0x80   :  { %v21_v19 = vpop.permute.xlu0 %20  }
  0x81   :  { %v37_v20 = vpop.permute.xlu1 %36   ;;  %133 = vst.msk [vmem:[%s333_s1 + $0x2] ss:$16 sm:$0x3] %vm8_vm0, %v21_v19   ;;  %134 = vst.msk [vmem:[%s333_s1 + $0x2] ss:$16 sm:$0xc] %vm8_vm0, %v21_v19  }
  0x82   :  { %137 = vst.msk [vmem:[%s333_s1 + $0x4] ss:$16 sm:$0x3] %vm8_vm0, %v37_v20   ;;  %138 = vst.msk [vmem:[%s333_s1 + $0x4] ss:$16 sm:$0xc] %vm8_vm0, %v37_v20  }
  0x84   :  { %v45_v21 = vpop.permute.xlu0 %44  }
  0x85   :  { %v53_v22 = vpop.permute.xlu1 %52   ;;  %139 = vst.msk [vmem:[%s333_s1 + $0x5] ss:$16 sm:$0x3] %vm8_vm0, %v45_v21   ;;  %140 = vst.msk [vmem:[%s333_s1 + $0x5] ss:$16 sm:$0xc] %vm8_vm0, %v45_v21  }
  0x86   :  { %141 = vst.msk [vmem:[%s333_s1 + $0x6] ss:$16 sm:$0x3] %vm8_vm0, %v53_v22   ;;  %142 = vst.msk [vmem:[%s333_s1 + $0x6] ss:$16 sm:$0xc] %vm8_vm0, %v53_v22  }
  0x88   :  { %v61_v23 = vpop.permute.xlu0 %60  }
  0x89   :  { %v69_v24 = vpop.permute.xlu1 %68   ;;  %143 = vst.msk [vmem:[%s333_s1 + $0x7] ss:$16 sm:$0x3] %vm8_vm0, %v61_v23   ;;  %144 = vst.msk [vmem:[%s333_s1 + $0x7] ss:$16 sm:$0xc] %vm8_vm0, %v61_v23  }
  0x8a   :  { %145 = vst.msk [vmem:[%s333_s1 + $0x8] ss:$16 sm:$0x3] %vm8_vm0, %v69_v24   ;;  %146 = vst.msk [vmem:[%s333_s1 + $0x8] ss:$16 sm:$0xc] %vm8_vm0, %v69_v24  }
  0x8c   :  { %v77_v25 = vpop.permute.xlu0 %76  }
  0x8d   :  { %v85_v26 = vpop.permute.xlu1 %84   ;;  %147 = vst.msk [vmem:[%s333_s1 + $0x9] ss:$16 sm:$0x3] %vm8_vm0, %v77_v25   ;;  %148 = vst.msk [vmem:[%s333_s1 + $0x9] ss:$16 sm:$0xc] %vm8_vm0, %v77_v25  }
  0x8e   :  { %149 = vst.msk [vmem:[%s333_s1 + $0xa] ss:$16 sm:$0x3] %vm8_vm0, %v85_v26   ;;  %150 = vst.msk [vmem:[%s333_s1 + $0xa] ss:$16 sm:$0xc] %vm8_vm0, %v85_v26  }
  0x90   :  { %v93_v27 = vpop.permute.xlu0 %92  }
  0x91   :  { %v101_v28 = vpop.permute.xlu1 %100   ;;  %151 = vst.msk [vmem:[%s333_s1 + $0xb] ss:$16 sm:$0x3] %vm8_vm0, %v93_v27   ;;  %152 = vst.msk [vmem:[%s333_s1 + $0xb] ss:$16 sm:$0xc] %vm8_vm0, %v93_v27  }
  0x92   :  { %153 = vst.msk [vmem:[%s333_s1 + $0xc] ss:$16 sm:$0x3] %vm8_vm0, %v101_v28   ;;  %154 = vst.msk [vmem:[%s333_s1 + $0xc] ss:$16 sm:$0xc] %vm8_vm0, %v101_v28  }
  0x94   :  { %v109_v29 = vpop.permute.xlu0 %108  }
  0x95   :  { %v117_v30 = vpop.permute.xlu1 %116   ;;  %155 = vst.msk [vmem:[%s333_s1 + $0xd] ss:$16 sm:$0x3] %vm8_vm0, %v109_v29   ;;  %156 = vst.msk [vmem:[%s333_s1 + $0xd] ss:$16 sm:$0xc] %vm8_vm0, %v109_v29  }
  0x96   :  { %157 = vst.msk [vmem:[%s333_s1 + $0xe] ss:$16 sm:$0x3] %vm8_vm0, %v117_v30   ;;  %158 = vst.msk [vmem:[%s333_s1 + $0xe] ss:$16 sm:$0xc] %vm8_vm0, %v117_v30  }
  0x98   :  { %v125_v31 = vpop.permute.xlu0 %124  }
  0x99   :  { %159 = vst.msk [vmem:[%s333_s1 + $0xf] ss:$16 sm:$0x3] %vm8_vm0, %v125_v31   ;;  %160 = vst.msk [vmem:[%s333_s1 + $0xf] ss:$16 sm:$0xc] %vm8_vm0, %v125_v31  }

// kernel: tile.33
= control target key start
LH: loop header
LB: loop body
LE: loop exit
PB: predicated region body
PF: predicated region fallthrough
CT: control target
= control target key end

     0   :  { %s22_s0 = inlined_call_operand.vmem [shape: f32[16], index: 0, kind: input, shape index: {}]   ;;  %s23_s1 = inlined_call_operand.vmem [shape: f32[4,16], index: 1, kind: output, shape index: {}]  }
   0x1   :  { %v4_v0 = vld [vmem:[%s22_s0] ss:$0 sm:$0xff] }
   0x2   :  { %5 = vst [vmem:[%s23_s1] sm:$0xf] %v4_v0 }

// kernel: tile.43
= control target key start
LH: loop header
LB: loop body
LE: loop exit
PB: predicated region body
PF: predicated region fallthrough
CT: control target
= control target key end

     0   :  { %s8_s6 = smov 3  ;;  %s22_s9 = smov 3  ;;  %vm41_vm0 = vcmask 1043458   ;;  %vm3_vm1 = vcmask 130048   ;;  %vm12_vm2 = vcmask 1048448   ;;  %vm19_vm3 = vcmask 917248   ;;  %s168_s0 = inlined_call_operand.vmem [shape: f32[2,12,16], index: 0, kind: input, shape index: {}]   ;;  %s169_s1 = inlined_call_operand.vmem [shape: f32[2,192], index: 1, kind: output, shape index: {}]  }
   0x1   :  { %v91_v0 = vld [vmem:[%s168_s0 + $0x7] ss:$16 sm:%s8_s6]   ;;  %s109_s10 = smov 112   ;;  %v93_v1 = vld [vmem:[%s168_s0 + $0x5] ss:$16 sm:%s22_s9]   ;;  %s15_s13 = smov 3 }
   0x2   :  { %10 = vrot.lane.b32.xlu0 %v91_v0, %s109_s10  ;;  %s110_s14 = smov 80   ;;  %v92_v2 = vld [vmem:[%s168_s0 + $0x6] ss:$16 sm:%s15_s13]   ;;  %s29_s17 = smov 3  ;;  %vm26_vm4 = vcmask 786048   ;;  %vm33_vm5 = vcmask 654848  }
   0x3   :  { %24 = vrot.lane.b32.xlu1 %v93_v1, %s110_s14  ;;  %v94_v3 = vld [vmem:[%s168_s0 + $0x4] ss:$16 sm:%s29_s17]   ;;  %s36_s20 = smov 3  ;;  %s39_s21 = smov 12  ;;  %vm45_vm6 = vcmask 523648   ;;  %vm59_vm7 = vcmask 392448  }
   0x4   :  { %v95_v4 = vld [vmem:[%s168_s0 + $0x3] ss:$16 sm:%s36_s20]   ;;  %v96_v5 = vld [vmem:[%s168_s0 - $0x15] ss:$16 sm:%s39_s21]   ;;  %s50_s26 = smov 3  ;;  %s111_s27 = smov 96  }
   0x5   :  { %v97_v6 = vld [vmem:[%s168_s0 + $0x2] ss:$16 sm:%s50_s26]   ;;  %s53_s30 = smov 12  ;;  %s112_s2 = smov 64   ;;  %v42_v7 = vsel %vm41_vm0, %v96_v5, %v95_v4  ;;  %vm73_vm8 = vcmask 261248  }
   0x6   :  { %17 = vrot.lane.b32.xlu0 %v92_v2, %s111_s27  ;;  %v98_v8 = vld [vmem:[%s168_s0 - $0x16] ss:$16 sm:%s53_s30]   ;;  %s64_s5 = smov 3  ;;  %s67_s6 = smov 12 }
   0x7   :  { %31 = vrot.lane.b32.xlu1 %v94_v3, %s112_s2  ;;  %v56_v9 = vsel %vm41_vm0, %v98_v8, %v97_v6  ;;  %v99_v10 = vld [vmem:[%s168_s0 + $0x1] ss:$16 sm:%s64_s5]   ;;  %v2_v12 = vld [vmem:[%s168_s0] ss:$8 sm:$0xf]   ;;  %s114_s13 = smov 32  }
   0x8   :  { %v100_v11 = vld [vmem:[%s168_s0 - $0x17] ss:$16 sm:%s67_s6]   ;;  %s113_s0 = smov 48   ;;  %4 = vst.msk [vmem:[#allocation0] ss:$8 sm:$0x3] %vm3_vm1, %v2_v12  }
   0x9   :  { %6 = vst.msk [vmem:[#allocation0 - $0xf] ss:$8 sm:$0xc] %vm3_vm1, %v2_v12   ;;  %v70_v13 = vsel %vm41_vm0, %v100_v11, %v99_v10  ;;  %s115_s14 = smov 16  }
   0xa   :  { %43 = vrot.lane.b32.xlu0 %v42_v7, %s113_s0 }
   0xb   :  { %57 = vrot.lane.b32.xlu1 %v56_v9, %s114_s13 }
   0xe   :  { %71 = vrot.lane.b32.xlu0 %v70_v13, %s115_s14 }
  0x74   :  { %v11_v14 = vpop.permute.xlu0 %10  }
  0x75   :  { %13 = vst.msk [vmem:[#allocation0] sm:$0x3] %vm12_vm2, %v11_v14   ;;  %v25_v15 = vpop.permute.xlu1 %24  }
  0x78   :  { %v18_v16 = vpop.permute.xlu0 %17  }
  0x79   :  { %20 = vst.msk [vmem:[#allocation0] sm:$0x3] %vm19_vm3, %v18_v16   ;;  %v32_v17 = vpop.permute.xlu1 %31  }
  0x7a   :  { %27 = vst.msk [vmem:[#allocation0] sm:$0x3] %vm26_vm4, %v25_v15  }
  0x7b   :  { %34 = vst.msk [vmem:[#allocation0] sm:$0x3] %vm33_vm5, %v32_v17  }
  0x7c   :  { %v44_v18 = vpop.permute.xlu0 %43  }
  0x7d   :  { %46 = vst.msk [vmem:[#allocation0] sm:$0x3] %vm45_vm6, %v44_v18   ;;  %48 = vst.msk [vmem:[#allocation0 + $0x6] sm:$0xc] %vm45_vm6, %v44_v18   ;;  %v58_v19 = vpop.permute.xlu1 %57  }
  0x7e   :  { %60 = vst.msk [vmem:[#allocation0] sm:$0x3] %vm59_vm7, %v58_v19   ;;  %62 = vst.msk [vmem:[#allocation0 + $0x6] sm:$0xc] %vm59_vm7, %v58_v19  }
  0x80   :  { %v72_v20 = vpop.permute.xlu0 %71  }
  0x81   :  { %74 = vst.msk [vmem:[#allocation0] sm:$0x3] %vm73_vm8, %v72_v20   ;;  %76 = vst.msk [vmem:[#allocation0 + $0x6] sm:$0xc] %vm73_vm8, %v72_v20  }
  0x88   :  { %v81_v21 = vld [vmem:[#allocation0] sm:$0x3]  ;;  %v86_v22 = vld [vmem:[#allocation0 + $0x8] sm:$0x3] }
  0x89   :  { %84 = vst [vmem:[%s169_s1] sm:$0x3] %v81_v21  ;;  %101 = vst [vmem:[%s169_s1 + $0x2] sm:$0x3] %v86_v22 }

// kernel: mul.103
= control target key start
LH: loop header
LB: loop body
LE: loop exit
PB: predicated region body
PF: predicated region fallthrough
CT: control target
= control target key end

     0   :  { %vm8_vm0 = vcmask 130048   ;;  %s40_s8 = smov 16   ;;  %s41_s9 = smov 32   ;;  %vm14_vm1 = vcmask 523648   ;;  %vm20_vm2 = vcmask 392448   ;;  %vm26_vm3 = vcmask 261248   ;;  %s58_s0 = inlined_call_operand.vmem [shape: f32[4,16], index: 0, kind: input, shape index: {}]   ;;  %s59_s1 = inlined_call_operand.vmem [shape: f32[64], index: 1, kind: output, shape index: {}]  }
   0x1   :  { %v5_v0 = vld [vmem:[%s58_s0] sm:$0xf]  ;;  %s39_s0 = smov 48  }
   0x2   :  { %6 = vst [vmem:[#allocation1] sm:$0xf] %v5_v0 }
   0x9   :  { %v11_v1 = vld [vmem:[#allocation1 + $0x3] sm:$0x1]   ;;  %v23_v2 = vld [vmem:[#allocation1 + $0x1] sm:$0x1]   ;;  %v7_v3 = vld [vmem:[#allocation1] sm:$0x1]  }
   0xa   :  { %12 = vrot.lane.b32.xlu0 %v11_v1, %s39_s0  ;;  %24 = vrot.lane.b32.xlu1 %v23_v2, %s40_s8  ;;  %v17_v4 = vld [vmem:[#allocation1 + $0x2] sm:$0x1]   ;;  %9 = vst.msk [vmem:[#allocation0] sm:$0x1] %vm8_vm0, %v7_v3  }
   0xe   :  { %18 = vrot.lane.b32.xlu0 %v17_v4, %s41_s9 }
  0x7c   :  { %v13_v5 = vpop.permute.xlu0 %12   ;;  %v25_v6 = vpop.permute.xlu1 %24  }
  0x7d   :  { %15 = vst.msk [vmem:[#allocation0] sm:$0x1] %vm14_vm1, %v13_v5  }
  0x80   :  { %v19_v7 = vpop.permute.xlu0 %18  }
  0x81   :  { %21 = vst.msk [vmem:[#allocation0] sm:$0x1] %vm20_vm2, %v19_v7  }
  0x82   :  { %27 = vst.msk [vmem:[#allocation0] sm:$0x1] %vm26_vm3, %v25_v6  }
  0x89   :  { %v32_v8 = vld [vmem:[#allocation0] sm:$0x1] }
  0x8a   :  { %35 = vst [vmem:[%s59_s1] sm:$0x1] %v32_v8 }

// kernel: matchmaker_forward.1
= control target key start
LH: loop header
LB: loop body
LE: loop exit
PB: predicated region body
PF: predicated region fallthrough
CT: control target
= control target key end

     0   :  { %vm2512_vm0 = vmmov 0   ;;  %vm1100_vm1 = vcmask 130048   ;;  %vm1799_vm2 = vcmask 1041409   ;;  %vm1396_vm3 = vcmask 392192   ;;  %s2514_s22 = smov 11   ;;  %s2515_s26 = smov 22   ;;  %s3761_s1 = inlined_call_operand.vmem [shape: f32[8,16,384], index: 1, kind: input, shape index: {}]   ;;  %s3762_s0 = inlined_call_operand.vmem [shape: f32[8,8,384], index: 0, kind: input, shape index: {}]   ;;  %s3763_s6 = inlined_call_operand.vmem [shape: f32[16,176], index: 6, kind: input, shape index: {}]   ;;  %s3764_s7 = inlined_call_operand.vmem [shape: f32[176,11], index: 7, kind: input, shape index: {}]   ;;  %s3765_s9 = inlined_call_operand.vmem [shape: f32[64,1], index: 9, kind: input, shape index: {}]   ;;  %s3766_s4 = inlined_call_operand.vmem [shape: f32[11,1], index: 4, kind: input, shape index: {}]   ;;  %s3767_s5 = inlined_call_operand.vmem [shape: f32[11,1], index: 5, kind: input, shape index: {}]   ;;  %s3768_s2 = inlined_call_operand.vmem [shape: f32[1,176], index: 2, kind: input, shape index: {}]   ;;  %s3769_s3 = inlined_call_operand.vmem [shape: f32[1,176], index: 3, kind: input, shape index: {}]   ;;  %s3770_s8 = inlined_call_operand.vmem [shape: f32[64,176], index: 8, kind: input, shape index: {}]   ;;  %s3771_s13 = inlined_call_operand.vmem [shape: f32[192,12], index: 13, kind: input, shape index: {}]   ;;  %s3772_s14 = inlined_call_operand.vmem [shape: f32[16,128], index: 14, kind: output, shape index: {}]   ;;  %s3773_s10 = inlined_call_operand.vmem [shape: f32[8,64], index: 10, kind: input, shape index: {}]   ;;  %s3774_s11 = inlined_call_operand.vmem [shape: f32[16,192], index: 11, kind: input, shape index: {}]   ;;  %s3775_s12 = inlined_call_operand.vmem [shape: f32[2,192], index: 12, kind: input, shape index: {}]  }
   0x1   :  { %v2595_v0 = vld [vmem:[%s3761_s1] sm:$0xff]  ;;  %v2600_v1 = vld [vmem:[%s3761_s1 + $0x8] sm:$0xff]  ;;  %v2605_v2 = vld [vmem:[%s3761_s1 + $0x10] sm:$0xff]  ;;  %vm1631_vm4 = vcmask 523264   ;;  %vm1876_vm5 = vcmask 89088   ;;  %vm1882_vm6 = vcmask 179288  }
   0x2   :  { %v216_v3 = vmul.f32 %v2595_v0, %v2595_v0  ;;  %v217_v4 = vmul.f32 %v2600_v1, %v2600_v1  ;;  %v218_v5 = vmul.f32 %v2605_v2, %v2605_v2  ;;  %v2616_v6 = vld [vmem:[%s3761_s1 + $0x18] sm:$0xff]  ;;  %v2621_v7 = vld [vmem:[%s3761_s1 + $0x20] sm:$0xff]  ;;  %v2626_v8 = vld [vmem:[%s3761_s1 + $0x28] sm:$0xff]  ;;  %s2516_s27 = smov 34   ;;  %vm2061_vm7 = vcmask 277680  }
   0x3   :  { %v219_v9 = vmul.f32 %v2616_v6, %v2616_v6  ;;  %v220_v10 = vmul.f32 %v2621_v7, %v2621_v7  ;;  %v221_v11 = vmul.f32 %v2626_v8, %v2626_v8  ;;  %v2637_v12 = vld [vmem:[%s3762_s0] sm:$0xff]  ;;  %v2642_v13 = vld [vmem:[%s3762_s0 + $0x8] sm:$0xff]  ;;  %v2647_v14 = vld [vmem:[%s3762_s0 + $0x10] sm:$0xff]  ;;  %vm2223_vm8 = vcmask 376080  }
   0x4   :  { %v264_v15 = vadd.f32 %v217_v4, %v216_v3  ;;  %v120_v16 = vmul.f32 %v2637_v12, %v2637_v12  ;;  %v121_v17 = vmul.f32 %v2642_v13, %v2642_v13  ;;  %v122_v18 = vmul.f32 %v2647_v14, %v2647_v14  ;;  %v2658_v19 = vld [vmem:[%s3761_s1 + $0x48] sm:$0xff]  ;;  %v2663_v20 = vld [vmem:[%s3761_s1 + $0x50] sm:$0xff]  ;;  %v2668_v21 = vld [vmem:[%s3761_s1 + $0x58] sm:$0xff] }
   0x5   :  { %v268_v22 = vadd.f32 %v220_v10, %v219_v9  ;;  %v225_v23 = vmul.f32 %v2658_v19, %v2658_v19  ;;  %v226_v24 = vmul.f32 %v2663_v20, %v2663_v20  ;;  %v2677_v25 = vld [vmem:[%s3761_s1 + $0x30] sm:$0xff]  ;;  %v2682_v26 = vld [vmem:[%s3761_s1 + $0x38] sm:$0xff]  ;;  %v2687_v27 = vld [vmem:[%s3761_s1 + $0x40] sm:$0xff]  ;;  %v227_v35 = vmul.f32 %v2668_v21, %v2668_v21 }
   0x6   :  { %v265_v28 = vadd.f32 %v264_v15, %v218_v5  ;;  %v144_v29 = vadd.f32 %v121_v17, %v120_v16  ;;  %v222_v30 = vmul.f32 %v2677_v25, %v2677_v25  ;;  %v223_v31 = vmul.f32 %v2682_v26, %v2682_v26  ;;  %v2696_v32 = vld [vmem:[%s3762_s0 + $0x18] sm:$0xff]  ;;  %v2701_v33 = vld [vmem:[%s3762_s0 + $0x20] sm:$0xff]  ;;  %v2706_v34 = vld [vmem:[%s3762_s0 + $0x28] sm:$0xff] }
   0x7   :  { %v276_v36 = vadd.f32 %v226_v24, %v225_v23  ;;  %v224_v37 = vmul.f32 %v2687_v27, %v2687_v27  ;;  %v123_v38 = vmul.f32 %v2696_v32, %v2696_v32  ;;  %v2717_v39 = vld [vmem:[%s3761_s1 + $0x60] sm:$0xff]  ;;  %v2722_v40 = vld [vmem:[%s3761_s1 + $0x68] sm:$0xff]  ;;  %v269_v41 = vadd.f32 %v268_v22, %v221_v11  ;;  %v2729_v45 = vld [vmem:[%s3761_s1 + $0x78] sm:$0xff] }
   0x8   :  { %266 = vadd.xlane.f32.xlu0 %v265_v28  ;;  %v145_v42 = vadd.f32 %v144_v29, %v122_v18  ;;  %v272_v43 = vadd.f32 %v223_v31, %v222_v30  ;;  %v124_v44 = vmul.f32 %v2701_v33, %v2701_v33  ;;  %v2734_v46 = vld [vmem:[%s3761_s1 + $0x80] sm:$0xff]  ;;  %v125_v47 = vmul.f32 %v2706_v34, %v2706_v34  ;;  %v2741_v48 = vld [vmem:[%s3761_s1 + $0x70] sm:$0xff]  ;;  %v2755_v52 = vld [vmem:[%s3762_s0 + $0x38] sm:$0xff] }
   0x9   :  { %v228_v49 = vmul.f32 %v2717_v39, %v2717_v39  ;;  %v229_v50 = vmul.f32 %v2722_v40, %v2722_v40  ;;  %v2750_v51 = vld [vmem:[%s3762_s0 + $0x30] sm:$0xff]  ;;  %v2760_v55 = vld [vmem:[%s3761_s1 + $0x88] sm:$0xff]  ;;  %v231_v56 = vmul.f32 %v2729_v45, %v2729_v45  ;;  %v232_v57 = vmul.f32 %v2734_v46, %v2734_v46  ;;  %v2774_v60 = vld [vmem:[%s3761_s1 + $0x98] sm:$0xff] }
   0xa   :  { %146 = vadd.xlane.f32.xlu1 %v145_v42  ;;  %v273_v53 = vadd.f32 %v272_v43, %v224_v37  ;;  %v148_v54 = vadd.f32 %v124_v44, %v123_v38  ;;  %v277_v58 = vadd.f32 %v276_v36, %v227_v35  ;;  %v2769_v59 = vld [vmem:[%s3761_s1 + $0x90] sm:$0xff]  ;;  %v230_v61 = vmul.f32 %v2741_v48, %v2741_v48  ;;  %v2785_v4 = vld [vmem:[%s3761_s1 + $0xa8] sm:$0xff]  ;;  %v2797_v11 = vld [vmem:[%s3762_s0 + $0x40] sm:$0xff] }
   0xb   :  { %v280_v62 = vadd.f32 %v229_v50, %v228_v49  ;;  %v126_v63 = vmul.f32 %v2750_v51, %v2750_v51  ;;  %v127_v3 = vmul.f32 %v2755_v52, %v2755_v52  ;;  %v2790_v5 = vld [vmem:[%s3761_s1 + $0xb0] sm:$0xff]  ;;  %v233_v9 = vmul.f32 %v2760_v55, %v2760_v55  ;;  %3805 = vst [vmem:[#allocation2_spill] sm:$0xff] %v2797_v11  ;;  %v2810_v23 = vld [vmem:[%s3761_s1 + $0xa0] sm:$0xff]  ;;  %v2815_v24 = vld [vmem:[%s3762_s0 + $0x48] sm:$0xff] }
   0xc   :  { %270 = vadd.xlane.f32.xlu0 %v269_v41  ;;  %v284_v10 = vadd.f32 %v232_v57, %v231_v56  ;;  %v149_v15 = vadd.f32 %v148_v54, %v125_v47  ;;  %v234_v16 = vmul.f32 %v2769_v59, %v2769_v59  ;;  %v235_v17 = vmul.f32 %v2774_v60, %v2774_v60  ;;  %v2820_v28 = vld [vmem:[%s3762_s0 + $0x50] sm:$0xff]  ;;  %v2827_v35 = vld [vmem:[%s3761_s1 + $0xb8] sm:$0xff]  ;;  %v2832_v37 = vld [vmem:[%s3761_s1 + $0xc0] sm:$0xff] }
   0xd   :  { %v237_v18 = vmul.f32 %v2785_v4, %v2785_v4  ;;  %v238_v22 = vmul.f32 %v2790_v5, %v2790_v5  ;;  %v281_v29 = vadd.f32 %v280_v62, %v230_v61  ;;  %v128_v30 = vmul.f32 %v2797_v11, %v2797_v11  ;;  %v2837_v38 = vld [vmem:[%s3761_s1 + $0xc8] sm:$0xff]  ;;  %v2848_v47 = vld [vmem:[%s3761_s1 + $0xd8] sm:$0xff]  ;;  %v2853_v49 = vld [vmem:[%s3761_s1 + $0xe0] sm:$0xff] }
   0xe   :  { %274 = vadd.xlane.f32.xlu1 %v273_v53  ;;  %v152_v31 = vadd.f32 %v127_v3, %v126_v63  ;;  %v285_v36 = vadd.f32 %v284_v10, %v233_v9  ;;  %v236_v41 = vmul.f32 %v2810_v23, %v2810_v23  ;;  %v288_v42 = vadd.f32 %v235_v17, %v234_v16  ;;  %v2860_v54 = vld [vmem:[%s3762_s0 + $0x58] sm:$0xff]  ;;  %v2869_v61 = vld [vmem:[%s3761_s1 + $0xd0] sm:$0xff]  ;;  %v2878_v3 = vld [vmem:[%s3762_s0 + $0x60] sm:$0xff] }
   0xf   :  { %v129_v43 = vmul.f32 %v2815_v24, %v2815_v24  ;;  %v130_v44 = vmul.f32 %v2820_v28, %v2820_v28  ;;  %v239_v50 = vmul.f32 %v2827_v35, %v2827_v35  ;;  %v292_v53 = vadd.f32 %v238_v22, %v237_v18  ;;  %3806 = vst [vmem:[#allocation3_spill] sm:$0xff] %v2860_v54  ;;  %v2883_v9 = vld [vmem:[%s3762_s0 + $0x68] sm:$0xff]  ;;  %v2895_v22 = vld [vmem:[%s3761_s1 + $0xf0] sm:$0xff] }
  0x10   :  { %278 = vadd.xlane.f32.xlu0 %v277_v58  ;;  %v153_v56 = vadd.f32 %v152_v31, %v128_v30  ;;  %v240_v57 = vmul.f32 %v2832_v37, %v2832_v37  ;;  %v241_v58 = vmul.f32 %v2837_v38, %v2837_v38  ;;  %3807 = vst [vmem:[#allocation4_spill] sm:$0xff] %v2869_v61  ;;  %3808 = vst [vmem:[#allocation5_spill] sm:$0xff] %v2878_v3  ;;  %v2890_v17 = vld [vmem:[%s3761_s1 + $0xe8] sm:$0xff]  ;;  %vm2063_vm9 = vcmask 272560  }
  0x11   :  { %v243_v62 = vmul.f32 %v2848_v47, %v2848_v47  ;;  %v244_v63 = vmul.f32 %v2853_v49, %v2853_v49  ;;  %v289_v10 = vadd.f32 %v288_v42, %v236_v41  ;;  %v156_v16 = vadd.f32 %v130_v44, %v129_v43  ;;  %3809 = vst [vmem:[#allocation6_spill] sm:$0xff] %v2890_v17  ;;  %v2911_v42 = vld [vmem:[%s3761_s1 + $0x108] sm:$0xff]  ;;  %v2916_v43 = vld [vmem:[%s3761_s1 + $0x110] sm:$0xff] }
  0x12   :  { %150 = vadd.xlane.f32.xlu1 %v149_v15  ;;  %v131_v15 = vmul.f32 %v2860_v54, %v2860_v54  ;;  %v293_v18 = vadd.f32 %v292_v53, %v239_v50  ;;  %3810 = vst [vmem:[#allocation7_spill] sm:$0xff] %v2895_v22  ;;  %v242_v30 = vmul.f32 %v2869_v61, %v2869_v61  ;;  %3811 = vst [vmem:[#allocation8_spill] sm:$0xff] %v2911_v42  ;;  %v2923_v53 = vld [vmem:[%s3762_s0 + $0x70] sm:$0xff]  ;;  %vm2225_vm10 = vcmask 370960  }
  0x13   :  { %v296_v31 = vadd.f32 %v241_v58, %v240_v57  ;;  %v133_v41 = vmul.f32 %v2883_v9, %v2883_v9  ;;  %3812 = vst [vmem:[#allocation9_spill] sm:$0xff] %v2916_v43  ;;  %v245_v44 = vmul.f32 %v2890_v17, %v2890_v17  ;;  %v300_v50 = vadd.f32 %v244_v63, %v243_v62  ;;  %v2936_v62 = vld [vmem:[%s3761_s1 + $0x100] sm:$0xff]  ;;  %v2941_v63 = vld [vmem:[%s3762_s0 + $0x78] sm:$0xff] }
  0x14   :  { %282 = vadd.xlane.f32.xlu0 %v281_v29  ;;  %v2900_v29 = vld [vmem:[%s3761_s1 + $0xf8] sm:$0xff]  ;;  %3813 = vst [vmem:[#allocation10_spill] sm:$0xff] %v2923_v53  ;;  %v246_v57 = vmul.f32 %v2895_v22, %v2895_v22  ;;  %v249_v54 = vmul.f32 %v2911_v42, %v2911_v42  ;;  %v250_v17 = vmul.f32 %v2916_v43, %v2916_v43  ;;  %3814 = vst [vmem:[#allocation11_spill] sm:$0xff] %v2936_v62 }
  0x15   :  { %v247_v58 = vmul.f32 %v2900_v29, %v2900_v29  ;;  %3815 = vst [vmem:[#allocation12_spill] sm:$0xff] %v2941_v63  ;;  %v2953_v42 = vld [vmem:[%s3761_s1 + $0x118] sm:$0xff]  ;;  %v301_v22 = vadd.f32 %v300_v50, %v245_v44  ;;  %v2979_v50 = vld [vmem:[%s3761_s1 + $0x140] sm:$0xff] }
  0x16   :  { %286 = vadd.xlane.f32.xlu1 %v285_v36  ;;  %v132_v36 = vmul.f32 %v2878_v3, %v2878_v3  ;;  %3817 = vst [vmem:[#allocation14_spill] sm:$0xff] %v2953_v42  ;;  %v2958_v3 = vld [vmem:[%s3761_s1 + $0x120] sm:$0xff]  ;;  %v2974_v44 = vld [vmem:[%s3761_s1 + $0x138] sm:$0xff]  ;;  %3821 = vst [vmem:[#allocation18_spill] sm:$0xff] %v2979_v50 }
  0x17   :  { %3818 = vst [vmem:[#allocation15_spill] sm:$0xff] %v2958_v3  ;;  %3820 = vst [vmem:[#allocation17_spill] sm:$0xff] %v2974_v44 }
  0x18   :  { %154 = vadd.xlane.f32.xlu0 %v153_v56  ;;  %v157_v56 = vadd.f32 %v156_v16, %v131_v15  ;;  %v297_v15 = vadd.f32 %v296_v31, %v242_v30  ;;  %v134_v16 = vmul.f32 %v2923_v53, %v2923_v53  ;;  %v160_v61 = vadd.f32 %v133_v41, %v132_v36 }
  0x19   :  { %v248_v30 = vmul.f32 %v2936_v62, %v2936_v62  ;;  %v304_v31 = vadd.f32 %v247_v58, %v246_v57  ;;  %v135_v36 = vmul.f32 %v2941_v63, %v2941_v63  ;;  %v308_v57 = vadd.f32 %v250_v17, %v249_v54  ;;  %v2986_v58 = vld [vmem:[%s3762_s0 + $0x88] sm:$0xff] }
  0x1a   :  { %290 = vadd.xlane.f32.xlu1 %v289_v10  ;;  %v2946_v10 = vld [vmem:[%s3762_s0 + $0x80] sm:$0xff]  ;;  %3822 = vst [vmem:[#allocation19_spill] sm:$0xff] %v2986_v58  ;;  %v161_v53 = vadd.f32 %v160_v61, %v134_v16  ;;  %v252_v62 = vmul.f32 %v2958_v3, %v2958_v3  ;;  %v255_v54 = vmul.f32 %v2974_v44, %v2974_v44  ;;  %v3004_v61 = vld [vmem:[%s3762_s0 + $0x90] sm:$0xff]  ;;  %v3016_v44 = vld [vmem:[%s3761_s1 + $0x148] sm:$0xff] }
  0x1b   :  { %3816 = vst [vmem:[#allocation13_spill] sm:$0xff] %v2946_v10  ;;  %v136_v41 = vmul.f32 %v2946_v10, %v2946_v10  ;;  %v2995_v10 = vld [vmem:[%s3761_s1 + $0x130] sm:$0xff]  ;;  %v256_v17 = vmul.f32 %v2979_v50, %v2979_v50  ;;  %3824 = vst [vmem:[#allocation21_spill] sm:$0xff] %v3004_v61  ;;  %v305_v16 = vadd.f32 %v304_v31, %v248_v30 }
  0x1c   :  { %294 = vadd.xlane.f32.xlu0 %v293_v18  ;;  %v2963_v18 = vld [vmem:[%s3761_s1 + $0x128] sm:$0xff]  ;;  %3823 = vst [vmem:[#allocation20_spill] sm:$0xff] %v2995_v10  ;;  %3826 = vst [vmem:[#allocation23_spill] sm:$0xff] %v3016_v44  ;;  %v254_v30 = vmul.f32 %v2995_v10, %v2995_v10 }
  0x1d   :  { %3819 = vst [vmem:[#allocation16_spill] sm:$0xff] %v2963_v18  ;;  %v253_v63 = vmul.f32 %v2963_v18, %v2963_v18  ;;  %v164_v3 = vadd.f32 %v136_v41, %v135_v36  ;;  %v3021_v18 = vld [vmem:[%s3761_s1 + $0x150] sm:$0xff]  ;;  %v3033_v36 = vld [vmem:[%s3762_s0 + $0xa0] sm:$0xff]  ;;  %v138_v41 = vmul.f32 %v3004_v61, %v3004_v61 }
  0x1e   :  { %158 = vadd.xlane.f32.xlu1 %v157_v56  ;;  %v251_v56 = vmul.f32 %v2953_v42, %v2953_v42  ;;  %v137_v42 = vmul.f32 %v2986_v58, %v2986_v58  ;;  %3827 = vst [vmem:[#allocation24_spill] sm:$0xff] %v3021_v18  ;;  %3829 = vst [vmem:[#allocation26_spill] sm:$0xff] %v3033_v36  ;;  %v316_v58 = vadd.f32 %v256_v17, %v255_v54  ;;  %v3060_v17 = vld [vmem:[%s3761_s1 + $0x160] sm:$0xff] }
  0x1f   :  { %v312_v31 = vadd.f32 %v253_v63, %v252_v62  ;;  %v3049_v62 = vld [vmem:[%s3761_s1 + $0x170] sm:$0xff]  ;;  %v258_v10 = vmul.f32 %v3021_v18, %v3021_v18  ;;  %v140_v54 = vmul.f32 %v3033_v36, %v3033_v36  ;;  %3830 = vst [vmem:[#allocation27_spill] sm:$0xff] %v3060_v17  ;;  %v260_v11 = vmul.f32 %v3060_v17, %v3060_v17 }
  0x20   :  { %298 = vadd.xlane.f32.xlu0 %v297_v15  ;;  %v3009_v15 = vld [vmem:[%s3762_s0 + $0x98] sm:$0xff]  ;;  %v309_v50 = vadd.f32 %v308_v57, %v251_v56  ;;  %v257_v57 = vmul.f32 %v3016_v44, %v3016_v44  ;;  %v165_v63 = vadd.f32 %v164_v3, %v137_v42  ;;  %v3065_v44 = vld [vmem:[%s3762_s0 + $0xa8] sm:$0xff]  ;;  %v3070_v3 = vld [vmem:[%s3762_s0 + $0xb0] sm:$0xff]  ;;  %v262_v18 = vmul.f32 %v3049_v62, %v3049_v62 }
  0x21   :  { %3825 = vst [vmem:[#allocation22_spill] sm:$0xff] %v3009_v15  ;;  %v139_v56 = vmul.f32 %v3009_v15, %v3009_v15  ;;  %3831 = vst [vmem:[#allocation28_spill] sm:$0xff] %v3065_v44  ;;  %v313_v42 = vadd.f32 %v312_v31, %v254_v30  ;;  %v3079_v15 = vld [vmem:[%s3761_s1 + $0x178] sm:$0xff]  ;;  %v142_v30 = vmul.f32 %v3070_v3, %v3070_v3 }
  0x22   :  { %302 = vadd.xlane.f32.xlu1 %v301_v22  ;;  %v3026_v22 = vld [vmem:[%s3761_s1 + $0x158] sm:$0xff]  ;;  %3832 = vst [vmem:[#allocation29_spill] sm:$0xff] %v3070_v3  ;;  %3833 = vst [vmem:[#allocation30_spill] sm:$0xff] %v3079_v15 }
  0x23   :  { %3828 = vst [vmem:[#allocation25_spill] sm:$0xff] %v3026_v22  ;;  %v259_v61 = vmul.f32 %v3026_v22, %v3026_v22  ;;  %v317_v22 = vadd.f32 %v316_v58, %v257_v57  ;;  %v3090_v58 = vld [vmem:[%s3762_s0 + $0xb8] sm:$0xff] }
  0x24   :  { %162 = vadd.xlane.f32.xlu0 %v161_v53  ;;  %v3044_v53 = vld [vmem:[%s3761_s1 + $0x168] sm:$0xff] }
  0x25   :  { %v261_v36 = vmul.f32 %v3044_v53, %v3044_v53  ;;  %v320_v43 = vadd.f32 %v259_v61, %v258_v10  ;;  %v143_v10 = vmul.f32 %v3090_v58, %v3090_v58 }
  0x26   :  { %306 = vadd.xlane.f32.xlu1 %v305_v16  ;;  %v168_v16 = vadd.f32 %v139_v56, %v138_v41  ;;  %v263_v41 = vmul.f32 %v3079_v15, %v3079_v15 }
  0x27   :  { %v324_v56 = vadd.f32 %v262_v18, %v261_v36  ;;  %v321_v57 = vadd.f32 %v320_v43, %v260_v11 }
  0x28   :  { %310 = vadd.xlane.f32.xlu0 %v309_v50  ;;  %v141_v50 = vmul.f32 %v3065_v44, %v3065_v44  ;;  %v169_v31 = vadd.f32 %v168_v16, %v140_v54 }
  0x2a   :  { %166 = vadd.xlane.f32.xlu1 %v165_v63  ;;  %v172_v61 = vadd.f32 %v142_v30, %v141_v50  ;;  %v325_v63 = vadd.f32 %v324_v56, %v263_v41 }
  0x2c   :  { %314 = vadd.xlane.f32.xlu0 %v313_v42  ;;  %v173_v17 = vadd.f32 %v172_v61, %v143_v10 }
  0x2e   :  { %318 = vadd.xlane.f32.xlu1 %v317_v22 }
  0x30   :  { %170 = vadd.xlane.f32.xlu0 %v169_v31 }
  0x32   :  { %322 = vadd.xlane.f32.xlu1 %v321_v57 }
  0x34   :  { %326 = vadd.xlane.f32.xlu0 %v325_v63 }
  0x36   :  { %174 = vadd.xlane.f32.xlu1 %v173_v17 }
  0x91   :  { %v267_v44 = vpop.xlane.xlu0 %266 }
  0x92   :  { %v328_v3 = vadd.f32 1e-26, %v267_v44 }
  0x93   :  { %v147_v42 = vpop.xlane.xlu1 %146 }
  0x94   :  { %v176_v54 = vadd.f32 1e-26, %v147_v42  ;;  %2383 = vrsqrt.f32 %v328_v3 }
  0x95   :  { %v271_v16 = vpop.xlane.xlu0 %270 }
  0x96   :  { %v329_v15 = vadd.f32 1e-26, %v271_v16  ;;  %2385 = vrsqrt.f32 %v176_v54 }
  0x97   :  { %v275_v18 = vpop.xlane.xlu1 %274 }
  0x98   :  { %2387 = vrsqrt.f32 %v329_v15  ;;  %v330_v11 = vadd.f32 1e-26, %v275_v18 }
  0x99   :  { %v279_v43 = vpop.xlane.xlu0 %278 }
  0x9a   :  { %v331_v22 = vadd.f32 1e-26, %v279_v43  ;;  %2389 = vrsqrt.f32 %v330_v11 }
  0x9b   :  { %v151_v36 = vpop.xlane.xlu1 %150 }
  0x9c   :  { %2391 = vrsqrt.f32 %v331_v22  ;;  %v177_v50 = vadd.f32 1e-26, %v151_v36 }
  0x9d   :  { %v283_v30 = vpop.xlane.xlu0 %282 }
  0x9e   :  { %2393 = vrsqrt.f32 %v177_v50  ;;  %v332_v17 = vadd.f32 1e-26, %v283_v30 }
  0x9f   :  { %v287_v31 = vpop.xlane.xlu1 %286 }
  0xa0   :  { %2395 = vrsqrt.f32 %v332_v17  ;;  %v333_v44 = vadd.f32 1e-26, %v287_v31 }
  0xa1   :  { %v155_v41 = vpop.xlane.xlu0 %154  ;;  %v2384_v3 = vpop.eup %2383 }
  0xa2   :  { %2397 = vrsqrt.f32 %v333_v44  ;;  %v178_v56 = vadd.f32 1e-26, %v155_v41  ;;  %v361_v42 = vmul.f32 %v2384_v3, %v2600_v1  ;;  %v360_v54 = vmul.f32 %v2384_v3, %v2595_v0 }
  0xa3   :  { %v3096_v57 = vpop.eup %2385  ;;  %v291_v15 = vpop.xlane.xlu1 %290 }
  0xa4   :  { %2399 = vrsqrt.f32 %v178_v56  ;;  %v334_v10 = vadd.f32 1e-26, %v291_v15  ;;  %v193_v61 = vmul.f32 %v3096_v57, %v2642_v13  ;;  %v192_v1 = vmul.f32 %v3096_v57, %v2637_v12 }
  0xa5   :  { %v2388_v63 = vpop.eup %2387  ;;  %v295_v16 = vpop.xlane.xlu0 %294 }
  0xa6   :  { %v364_v18 = vmul.f32 %v2388_v63, %v2621_v7  ;;  %v363_v11 = vmul.f32 %v2388_v63, %v2616_v6  ;;  %v335_v43 = vadd.f32 1e-26, %v295_v16  ;;  %2401 = vrsqrt.f32 %v334_v10 }
  0xa7   :  { %v2390_v22 = vpop.eup %2389  ;;  %v159_v36 = vpop.xlane.xlu1 %158  ;;  %v409_v50 = vpack.c.bf16 %v193_v61, %v193_v61  ;;  %v365_v16 = vmul.f32 %v2388_v63, %v2626_v8 }
  0xa8   :  { %v433_v30 = vpack.c.bf16 %v364_v18, %v361_v42  ;;  %v432_v17 = vpack.c.bf16 %v363_v11, %v360_v54  ;;  %2403 = vrsqrt.f32 %v335_v43  ;;  %v179_v31 = vadd.f32 1e-26, %v159_v36 }
  0xa9   :  { %v2392_v13 = vpop.eup %2391  ;;  %v367_v44 = vmul.f32 %v2390_v22, %v2682_v26  ;;  %488 = vmatprep.mubr.bf16.mxu1 %v409_v50  ;;  %v366_v0 = vmul.f32 %v2390_v22, %v2677_v25  ;;  %v299_v7 = vpop.xlane.xlu0 %298  ;;  %v2511_v42 = vmov 0.0   ;;  %v408_v54 = vpack.c.bf16 %v192_v1, %v192_v1 }
  0xaa   :  { %470 = vmatprep.subr.bf16.mxu1 %v433_v30  ;;  %2405 = vrsqrt.f32 %v179_v31  ;;  %v370_v6 = vmul.f32 %v2392_v13, %v2663_v20  ;;  %v369_v41 = vmul.f32 %v2392_v13, %v2658_v19  ;;  %v336_v56 = vadd.f32 1e-26, %v299_v7  ;;  %1874 = vst [vmem:[%s3772_s14] sm:$0xff] %v2511_v42  ;;  %1875 = vst [vmem:[%s3772_s14 + $0x8] sm:$0xff] %v2511_v42 }
  0xab   :  { %v3110_v15 = vpop.eup %2393  ;;  %471 = vmatpush1.bf16.xpose.msra.mxu1 %v432_v17  ;;  %v303_v10 = vpop.xlane.xlu1 %302  ;;  %v362_v50 = vmul.f32 %v2384_v3, %v2605_v2 }
  0xac   :  { %v436_v61 = vpack.c.bf16 %v370_v6, %v367_v44  ;;  %v435_v26 = vpack.c.bf16 %v369_v41, %v366_v0  ;;  %2289 = vmatprep.subr.bf16.mxu1 %v2511_v42  ;;  %2407 = vrsqrt.f32 %v336_v56  ;;  %v337_v25 = vadd.f32 1e-26, %v303_v10 }
  0xad   :  { %v3113_v12 = vpop.eup %2395  ;;  %v163_v20 = vpop.xlane.xlu0 %162  ;;  %v196_v19 = vmul.f32 %v3110_v15, %v2701_v33  ;;  %v195_v11 = vmul.f32 %v3110_v15, %v2696_v32  ;;  %v434_v32 = vpack.c.bf16 %v365_v16, %v362_v50  ;;  %v368_v0 = vmul.f32 %v2390_v22, %v2687_v27 }
  0xae   :  { %550 = vmatprep.subr.bf16.mxu0 %v436_v61  ;;  %2409 = vrsqrt.f32 %v337_v25  ;;  %v180_v18 = vadd.f32 1e-26, %v163_v20  ;;  %v373_v43 = vmul.f32 %v3113_v12, %v2722_v40  ;;  %v372_v8 = vmul.f32 %v3113_v12, %v2717_v39 }
  0xaf   :  { %v2398_v36 = vpop.eup %2397  ;;  %551 = vmatpush1.bf16.xpose.msra.mxu0 %v435_v26  ;;  %v412_v30 = vpack.c.bf16 %v196_v19, %v196_v19  ;;  %v307_v63 = vpop.xlane.xlu1 %306  ;;  %v411_v2 = vpack.c.bf16 %v195_v11, %v195_v11  ;;  %v194_v27 = vmul.f32 %v3096_v57, %v2647_v14 }
  0xb0   :  { %2411 = vrsqrt.f32 %v180_v18  ;;  %v376_v33 = vmul.f32 %v2398_v36, %v2734_v46  ;;  %v375_v17 = vmul.f32 %v2398_v36, %v2729_v45  ;;  %v338_v31 = vadd.f32 1e-26, %v307_v63 }
  0xb1   :  { %v3127_v44 = vpop.eup %2399  ;;  %568 = vmatprep.mubr.bf16.mxu0 %v412_v30  ;;  %v311_v40 = vpop.xlane.xlu0 %310  ;;  %v371_v46 = vmul.f32 %v2392_v13, %v2668_v21  ;;  %v377_v19 = vmul.f32 %v2398_v36, %v2760_v55 }
  0xb2   :  { %489 = vmatmul.mubr.bf16.vlgmr.msra.gmra.mxu1 %v408_v54  ;;  %v439_v3 = vpack.c.bf16 %v376_v33, %v373_v43  ;;  %v339_v1 = vadd.f32 1e-26, %v311_v40  ;;  %2413 = vrsqrt.f32 %v338_v31  ;;  %v438_v45 = vpack.c.bf16 %v375_v17, %v372_v8 }
  0xb3   :  { %v3130_v39 = vpop.eup %2401  ;;  %2290 = vmatpush3.bf16.xpose.msra.mxu1 %v434_v32  ;;  %2291 = vmatprep.mubr.msk.bf16.mxu1 %vm2512_vm0, %v2511_v42  ;;  %v199_v7 = vmul.f32 %v3127_v44, %v2755_v52  ;;  %v167_v6 = vpop.xlane.xlu1 %166  ;;  %v198_v21 = vmul.f32 %v3127_v44, %v2750_v51  ;;  %v437_v57 = vpack.c.bf16 %v371_v46, %v368_v0 }
  0xb4   :  { %630 = vmatprep.subr.bf16.mxu0 %v439_v3  ;;  %2295 = vmatprep.subr.bf16.mxu1 %v2511_v42  ;;  %2415 = vrsqrt.f32 %v339_v1  ;;  %v181_v22 = vadd.f32 1e-26, %v167_v6  ;;  %v379_v41 = vmul.f32 %v3130_v39, %v2774_v60  ;;  %v378_v60 = vmul.f32 %v3130_v39, %v2769_v59  ;;  %v3834_v1 = vld [vmem:[#allocation9_spill] sm:$0xff]  ;;  %v3835_v6 = vld [vmem:[#allocation2_spill] sm:$0xff] }
  0xb5   :  { %v3142_v56 = vpop.eup %2403  ;;  %v415_v10 = vpack.c.bf16 %v199_v7, %v199_v7  ;;  %v315_v61 = vpop.xlane.xlu0 %314  ;;  %v410_v54 = vpack.c.bf16 %v194_v27, %v194_v27  ;;  %v414_v59 = vpack.c.bf16 %v198_v21, %v198_v21  ;;  %v200_v27 = vmul.f32 %v3127_v44, %v3835_v6  ;;  %v3838_v21 = vld [vmem:[#allocation8_spill] sm:$0xff]  ;;  %v3839_v44 = vld [vmem:[#allocation13_spill] sm:$0xff] }
  0xb6   :  { %569 = vmatmul.mubr.bf16.vlgmr.msra.gmra.mxu0 %v411_v2  ;;  %v382_v52 = vmul.f32 %v3142_v56, %v2790_v5  ;;  %v340_v13 = vadd.f32 1e-26, %v315_v61  ;;  %2417 = vrsqrt.f32 %v181_v22  ;;  %v381_v26 = vmul.f32 %v3142_v56, %v2785_v4  ;;  %v3836_v22 = vld [vmem:[#allocation5_spill] sm:$0xff] }
  0xb7   :  { %v3148_v14 = vpop.eup %2405  ;;  %631 = vmatpush1.bf16.xpose.msra.mxu0 %v438_v45  ;;  %648 = vmatprep.mubr.bf16.mxu0 %v415_v10  ;;  %v319_v25 = vpop.xlane.xlu1 %318  ;;  %v374_v5 = vmul.f32 %v3113_v12, %v2741_v48  ;;  %v3837_v10 = vld [vmem:[#allocation7_spill] sm:$0xff]  ;;  %v3853_v6 = vld [vmem:[#allocation21_spill] sm:$0xff] }
  0xb8   :  { %v442_v16 = vpack.c.bf16 %v382_v52, %v379_v41  ;;  %2419 = vrsqrt.f32 %v340_v13  ;;  %v341_v51 = vadd.f32 1e-26, %v319_v25  ;;  %v202_v18 = vmul.f32 %v3148_v14, %v2820_v28  ;;  %v3841_v25 = vld [vmem:[#allocation18_spill] sm:$0xff] }
  0xb9   :  { %v3154_v20 = vpop.eup %2407  ;;  %v171_v11 = vpop.xlane.xlu0 %170  ;;  %v441_v48 = vpack.c.bf16 %v381_v26, %v378_v60  ;;  %v197_v28 = vmul.f32 %v3110_v15, %v2706_v34  ;;  %v440_v8 = vpack.c.bf16 %v377_v19, %v374_v5  ;;  %v201_v33 = vmul.f32 %v3148_v14, %v2815_v24  ;;  %v3840_v60 = vld [vmem:[#allocation16_spill] sm:$0xff]  ;;  %v3843_v19 = vld [vmem:[#allocation6_spill] sm:$0xff] }
  0xba   :  { %2292 = vmatmul.mubr.bf16.vlgmr.msra.gmra.mxu1 %v410_v54  ;;  %710 = vmatprep.subr.bf16.mxu0 %v442_v16  ;;  %2421 = vrsqrt.f32 %v341_v51  ;;  %v385_v4 = vmul.f32 %v3154_v20, %v2837_v38  ;;  %v182_v43 = vadd.f32 1e-26, %v171_v11  ;;  %v418_v55 = vpack.c.bf16 %v202_v18, %v202_v18  ;;  %v3842_v51 = vld [vmem:[#allocation4_spill] sm:$0xff] }
  0xbb   :  { %v3163_v50 = vpop.eup %2409  ;;  %2296 = vmatpush3.bf16.xpose.msra.mxu1 %v437_v57  ;;  %2297 = vmatprep.mubr.msk.bf16.mxu1 %vm2512_vm0, %v2511_v42  ;;  %v323_v12 = vpop.xlane.xlu1 %322  ;;  %v384_v34 = vmul.f32 %v3154_v20, %v2832_v37  ;;  %v413_v40 = vpack.c.bf16 %v197_v28, %v197_v28  ;;  %v417_v3 = vpack.c.bf16 %v201_v33, %v201_v33 }
  0xbc   :  { %2301 = vmatprep.subr.bf16.mxu1 %v2511_v42  ;;  %v388_v36 = vmul.f32 %v3163_v50, %v2853_v49  ;;  %v342_v30 = vadd.f32 1e-26, %v323_v12  ;;  %2423 = vrsqrt.f32 %v182_v43  ;;  %v387_v49 = vmul.f32 %v3163_v50, %v2848_v47 }
  0xbd   :  { %v3172_v38 = vpop.eup %2411  ;;  %v327_v63 = vpop.xlane.xlu0 %326  ;;  %v380_v37 = vmul.f32 %v3130_v39, %v2810_v23  ;;  %v383_v47 = vmul.f32 %v3142_v56, %v2827_v35  ;;  %v416_v57 = vpack.c.bf16 %v200_v27, %v200_v27  ;;  %v386_v5 = vmul.f32 %v3154_v20, %v3842_v51  ;;  %v3861_v51 = vld [vmem:[#allocation30_spill] sm:$0xff] }
  0xbe   :  { %649 = vmatmul.mubr.bf16.vlgmr.msra.gmra.mxu0 %v414_v59  ;;  %v445_v17 = vpack.c.bf16 %v388_v36, %v385_v4  ;;  %v343_v31 = vadd.f32 1e-26, %v327_v63  ;;  %2425 = vrsqrt.f32 %v342_v30  ;;  %v205_v15 = vmul.f32 %v3172_v38, %v2883_v9  ;;  %v3845_v36 = vld [vmem:[#allocation12_spill] sm:$0xff]  ;;  %v3846_v30 = vld [vmem:[#allocation15_spill] sm:$0xff]  ;;  %v3847_v63 = vld [vmem:[#allocation17_spill] sm:$0xff] }
  0xbf   :  { %v3176_v32 = vpop.eup %2413  ;;  %711 = vmatpush1.bf16.xpose.msra.mxu0 %v441_v48  ;;  %728 = vmatprep.mubr.bf16.mxu0 %v418_v55  ;;  %v175_v0 = vpop.xlane.xlu1 %174  ;;  %v444_v9 = vpack.c.bf16 %v387_v49, %v384_v34  ;;  %v443_v35 = vpack.c.bf16 %v383_v47, %v380_v37  ;;  %v204_v41 = vmul.f32 %v3172_v38, %v3836_v22  ;;  %v3844_v48 = vld [vmem:[#allocation3_spill] sm:$0xff]  ;;  %v3849_v34 = vld [vmem:[#allocation25_spill] sm:$0xff] }
  0xc0   :  { %790 = vmatprep.subr.bf16.mxu0 %v445_v17  ;;  %2427 = vrsqrt.f32 %v343_v31  ;;  %v391_v24 = vmul.f32 %v3176_v32, %v2900_v29  ;;  %v421_v46 = vpack.c.bf16 %v205_v15, %v205_v15  ;;  %v183_v7 = vadd.f32 1e-26, %v175_v0  ;;  %v3848_v17 = vld [vmem:[#allocation22_spill] sm:$0xff] }
  0xc1   :  { %v2416_v2 = vpop.eup %2415  ;;  %v390_v61 = vmul.f32 %v3176_v32, %v3837_v10  ;;  %v420_v16 = vpack.c.bf16 %v204_v41, %v204_v41  ;;  %v389_v18 = vmul.f32 %v3163_v50, %v3843_v19  ;;  %v203_v55 = vmul.f32 %v3148_v14, %v3844_v48  ;;  %v3856_v10 = vld [vmem:[#allocation20_spill] sm:$0xff] }
  0xc2   :  { %2298 = vmatmul.mubr.bf16.vlgmr.msra.gmra.mxu1 %v413_v40  ;;  %v394_v45 = vmul.f32 %v2416_v2, %v3834_v1  ;;  %v393_v52 = vmul.f32 %v2416_v2, %v3838_v21  ;;  %2429 = vrsqrt.f32 %v183_v7  ;;  %v3857_v21 = vld [vmem:[#allocation23_spill] sm:$0xff]  ;;  %v1098_v48 = vld [vmem:[%s3763_s6 + $0x10] sm:$0xff] }
  0xc3   :  { %2302 = vmatpush3.bf16.xpose.msra.mxu1 %v440_v8  ;;  %2303 = vmatprep.mubr.msk.bf16.mxu1 %vm2512_vm0, %v2511_v42  ;;  %v3193_v29 = vpop.eup %2417  ;;  %v446_v20 = vpack.c.bf16 %v389_v18, %v386_v5  ;;  %v419_v31 = vpack.c.bf16 %v203_v55, %v203_v55  ;;  %v1096_v55 = vld [vmem:[%s3763_s6] sm:$0xff] }
  0xc4   :  { %2307 = vmatprep.subr.bf16.mxu1 %v2511_v42  ;;  %v448_v23 = vpack.c.bf16 %v394_v45, %v391_v24  ;;  %v208_v13 = vmul.f32 %v3193_v29, %v3839_v44  ;;  %v447_v59 = vpack.c.bf16 %v393_v52, %v390_v61  ;;  %v207_v50 = vmul.f32 %v3193_v29, %v3845_v36  ;;  %v3850_v24 = vld [vmem:[#allocation11_spill] sm:$0xff]  ;;  %v1386_v36 = vld [vmem:[%s3764_s7 + $0x60] sm:$0xff] }
  0xc5   :  { %v3198_v39 = vpop.eup %2419  ;;  %v392_v0 = vmul.f32 %v3176_v32, %v3850_v24 }
  0xc6   :  { %729 = vmatmul.mubr.bf16.vlgmr.msra.gmra.mxu0 %v417_v3  ;;  %v397_v26 = vmul.f32 %v3198_v39, %v3840_v60  ;;  %v424_v4 = vpack.c.bf16 %v208_v13, %v208_v13  ;;  %v396_v8 = vmul.f32 %v3198_v39, %v3846_v30  ;;  %v423_v40 = vpack.c.bf16 %v207_v50, %v207_v50  ;;  %v3851_v3 = vld [vmem:[#allocation14_spill] sm:$0xff]  ;;  %v3859_v60 = vld [vmem:[#allocation28_spill] sm:$0xff]  ;;  %v1385_v50 = vld [vmem:[%s3764_s7 + $0x58] sm:$0xff] }
  0xc7   :  { %v3202_v56 = vpop.eup %2421  ;;  %791 = vmatpush1.bf16.xpose.msra.mxu0 %v444_v9  ;;  %808 = vmatprep.mubr.bf16.mxu0 %v421_v46  ;;  %v395_v37 = vmul.f32 %v2416_v2, %v3851_v3  ;;  %v3852_v9 = vld [vmem:[#allocation10_spill] sm:$0xff]  ;;  %v3854_v2 = vld [vmem:[#allocation24_spill] sm:$0xff]  ;;  %v398_v61 = vmul.f32 %v3198_v39, %v3856_v10 }
  0xc8   :  { %870 = vmatprep.subr.bf16.mxu0 %v448_v23  ;;  %v400_v54 = vmul.f32 %v3202_v56, %v3841_v25  ;;  %v399_v33 = vmul.f32 %v3202_v56, %v3847_v63  ;;  %v206_v46 = vmul.f32 %v3172_v38, %v3852_v9  ;;  %v401_v52 = vmul.f32 %v3202_v56, %v3857_v21  ;;  %v3860_v56 = vld [vmem:[#allocation27_spill] sm:$0xff]  ;;  %v1384_v30 = vld [vmem:[%s3764_s7 + $0x50] sm:$0xff]  ;;  %v1382_v63 = vld [vmem:[%s3764_s7 + $0x40] sm:$0xff] }
  0xc9   :  { %v3217_v11 = vpop.eup %2423  ;;  %v449_v7 = vpack.c.bf16 %v395_v37, %v392_v0 }
  0xca   :  { %2304 = vmatmul.mubr.bf16.vlgmr.msra.gmra.mxu1 %v416_v57  ;;  %v451_v12 = vpack.c.bf16 %v400_v54, %v397_v26  ;;  %v211_v14 = vmul.f32 %v3217_v11, %v3848_v17  ;;  %v450_v47 = vpack.c.bf16 %v399_v33, %v396_v8  ;;  %v210_v32 = vmul.f32 %v3217_v11, %v3853_v6  ;;  %v3858_v57 = vld [vmem:[#allocation19_spill] sm:$0xff] }
  0xcb   :  { %2308 = vmatpush3.bf16.xpose.msra.mxu1 %v443_v35  ;;  %2309 = vmatprep.mubr.msk.bf16.mxu1 %vm2512_vm0, %v2511_v42  ;;  %v2426_v43 = vpop.eup %2425  ;;  %v3855_v35 = vld [vmem:[#allocation29_spill] sm:$0xff]  ;;  %v422_v41 = vpack.c.bf16 %v206_v46, %v206_v46  ;;  %v452_v25 = vpack.c.bf16 %v401_v52, %v398_v61  ;;  %v1383_v8 = vld [vmem:[%s3764_s7 + $0x48] sm:$0xff] }
  0xcc   :  { %2313 = vmatprep.subr.bf16.mxu1 %v2511_v42  ;;  %v403_v49 = vmul.f32 %v2426_v43, %v3849_v34  ;;  %v427_v1 = vpack.c.bf16 %v211_v14, %v211_v14  ;;  %v402_v27 = vmul.f32 %v2426_v43, %v3854_v2  ;;  %v426_v38 = vpack.c.bf16 %v210_v32, %v210_v32 }
  0xcd   :  { %v2428_v28 = vpop.eup %2427 }
  0xce   :  { %809 = vmatmul.mubr.bf16.vlgmr.msra.gmra.mxu0 %v420_v16  ;;  %v406_v15 = vmul.f32 %v2428_v28, %v3049_v62  ;;  %v405_v23 = vmul.f32 %v2428_v28, %v3044_v53  ;;  %v209_v53 = vmul.f32 %v3193_v29, %v3858_v57  ;;  %v404_v16 = vmul.f32 %v2426_v43, %v3860_v56  ;;  %v3862_v29 = vld [vmem:[#allocation26_spill] sm:$0xff] }
  0xcf   :  { %871 = vmatpush1.bf16.xpose.msra.mxu0 %v447_v59  ;;  %888 = vmatprep.mubr.bf16.mxu0 %v424_v4  ;;  %v2430_v45 = vpop.eup %2429  ;;  %v407_v5 = vmul.f32 %v2428_v28, %v3861_v51  ;;  %v212_v19 = vmul.f32 %v3217_v11, %v3862_v29  ;;  %v1099_v11 = vld [vmem:[%s3763_s6 + $0x18] sm:$0xff]  ;;  %v1388_v28 = vld [vmem:[%s3764_s7 + $0x70] sm:$0xff] }
  0xd0   :  { %950 = vmatprep.subr.bf16.mxu0 %v451_v12  ;;  %v454_v62 = vpack.c.bf16 %v406_v15, %v403_v49  ;;  %v214_v22 = vmul.f32 %v2430_v45, %v3855_v35  ;;  %v453_v44 = vpack.c.bf16 %v405_v23, %v402_v27  ;;  %v213_v26 = vmul.f32 %v2430_v45, %v3859_v60  ;;  %v1389_v12 = vld [vmem:[%s3764_s7 + $0x78] sm:$0xff] }
  0xd1   :  { %v425_v39 = vpack.c.bf16 %v209_v53, %v209_v53  ;;  %v455_v18 = vpack.c.bf16 %v407_v5, %v404_v16  ;;  %v428_v59 = vpack.c.bf16 %v212_v19, %v212_v19  ;;  %v215_v4 = vmul.f32 %v2430_v45, %v3090_v58  ;;  %v1097_v58 = vld [vmem:[%s3763_s6 + $0x8] sm:$0xff] }
  0xd2   :  { %2310 = vmatmul.mubr.bf16.vlgmr.msra.gmra.mxu1 %v419_v31  ;;  %v430_v13 = vpack.c.bf16 %v214_v22, %v214_v22  ;;  %v429_v54 = vpack.c.bf16 %v213_v26, %v213_v26 }
  0xd3   :  { %2314 = vmatpush3.bf16.xpose.msra.mxu1 %v446_v20  ;;  %2315 = vmatprep.mubr.msk.bf16.mxu1 %vm2512_vm0, %v2511_v42  ;;  %v431_v43 = vpack.c.bf16 %v215_v4, %v215_v4  ;;  %v1387_v20 = vld [vmem:[%s3764_s7 + $0x68] sm:$0xff] }
  0xd4   :  { %2319 = vmatprep.subr.bf16.mxu1 %v2511_v42 }
  0xd6   :  { %889 = vmatmul.mubr.bf16.vlgmr.msra.gmra.mxu0 %v423_v40 }
  0xd7   :  { %951 = vmatpush1.bf16.xpose.msra.mxu0 %v450_v47  ;;  %968 = vmatprep.mubr.bf16.mxu0 %v427_v1 }
  0xd8   :  { %1030 = vmatprep.subr.bf16.mxu0 %v454_v62 }
  0xda   :  { %2316 = vmatmul.mubr.bf16.vlgmr.msra.gmra.mxu1 %v422_v41 }
  0xdb   :  { %2320 = vmatpush3.bf16.xpose.msra.mxu1 %v449_v7  ;;  %2321 = vmatprep.mubr.msk.bf16.mxu1 %vm2512_vm0, %v2511_v42 }
  0xdc   :  { %2325 = vmatprep.subr.bf16.mxu1 %v2511_v42 }
  0xde   :  { %969 = vmatmul.mubr.bf16.vlgmr.msra.gmra.mxu0 %v426_v38 }
  0xdf   :  { %1031 = vmatpush1.bf16.xpose.msra.mxu0 %v453_v44  ;;  %1048 = vmatprep.mubr.bf16.mxu0 %v430_v13 }
  0xe0   :  { %1153 = vmatprep.subr.mxu0 %v1099_v11 }
  0xe2   :  { %2322 = vmatmul.mubr.bf16.vlgmr.msra.gmra.mxu1 %v425_v39 }
  0xe3   :  { %2326 = vmatpush3.bf16.xpose.msra.mxu1 %v452_v25  ;;  %2327 = vmatprep.mubr.msk.bf16.mxu1 %vm2512_vm0, %v2511_v42 }
  0xe4   :  { %2331 = vmatprep.subr.bf16.mxu1 %v2511_v42 }
  0xe6   :  { %1049 = vmatmul.mubr.bf16.vlgmr.msra.gmra.mxu0 %v429_v54 }
  0xe7   :  { %1189 = vmatprep.mubr.f32.mxu0 %v2511_v42  ;;  %1154 = vmatpush1.msra.mxu0 %v1098_v48 }
  0xe8   :  { %1155 = vmatprep.subr.mxu0 %v1097_v58 }
  0xe9   :  { %1156 = vmatpush1.msra.mxu0 %v1096_v55 }
  0xea   :  { %2328 = vmatmul.mubr.bf16.vlgmr.msra.gmra.mxu1 %v428_v59  ;;  %2337 = vmatprep.subr.mxu0 %v2511_v42 }
  0xeb   :  { %2332 = vmatpush3.bf16.xpose.msra.mxu1 %v455_v18  ;;  %2333 = vmatprep.mubr.msk.bf16.mxu1 %vm2512_vm0, %v2511_v42 }
  0xec   :  { %1421 = vmatprep.subr.mxu1 %v2511_v42 }
  0xf2   :  { %2334 = vmatmul.mubr.bf16.vlgmr.msra.gmra.mxu1 %v431_v43 }
  0xf3   :  { %1422 = vmatpush1.msra.mxu1 %v1389_v12 }
  0xf4   :  { %1423 = vmatprep.subr.mxu1 %v2511_v42 }
  0xf5   :  { %1424 = vmatpush1.msra.mxu1 %v1388_v28 }
  0xf6   :  { %1425 = vmatprep.subr.mxu1 %v2511_v42 }
  0xf7   :  { %1426 = vmatpush1.msra.mxu1 %v1387_v20 }
  0xf8   :  { %1427 = vmatprep.subr.mxu1 %v2511_v42 }
  0xf9   :  { %1428 = vmatpush1.msra.mxu1 %v1386_v36 }
  0xfa   :  { %1429 = vmatprep.subr.mxu1 %v2511_v42 }
  0xfb   :  { %1430 = vmatpush1.msra.mxu1 %v1385_v50 }
  0xfc   :  { %1431 = vmatprep.subr.mxu1 %v2511_v42 }
  0xfd   :  { %1432 = vmatpush1.msra.mxu1 %v1384_v30 }
  0xfe   :  { %1433 = vmatprep.subr.mxu1 %v2511_v42 }
  0xff   :  { %1434 = vmatpush1.msra.mxu1 %v1383_v8 }
 0x100   :  { %1435 = vmatprep.subr.mxu1 %v2511_v42 }
 0x101   :  { %1436 = vmatpush1.msra.mxu1 %v1382_v63 }
 0x102   :  { %1437 = vmatprep.subr.mxu1 %v2511_v42 }
 0x172   :  { %v490_v33 = vpop.f32.mrf.mxu1 }
 0x174   :  { %v492_v17 = vpop.f32.mrf.mxu1 }
 0x176   :  { %v493_v14 = vpop.f32.mrf.mxu1  ;;  %v570_v31 = vpop.f32.mrf.mxu0 }
 0x178   :  { %v494_v34 = vpop.f32.mrf.mxu1  ;;  %v572_v49 = vpop.f32.mrf.mxu0 }
 0x17a   :  { %v530_v15 = vpop.f32.mrf.mxu1  ;;  %v573_v40 = vpop.f32.mrf.mxu0 }
 0x17b   :  { %v531_v24 = vadd.f32 %v530_v15, %v490_v33 }
 0x17c   :  { %v2293_v0 = vpop.f32.mrf.mxu1  ;;  %v574_v3 = vpop.f32.mrf.mxu0 }
 0x17d   :  { %v1779_v37 = vsel %vm1100_vm1, %v531_v24, -inf  ;;  %2231 = vmatmul.mubr.msk.f32.vlgmr.msra.gmra.mxu0 %vm1100_vm1, %v531_v24 }
 0x17e   :  { %v1780_v47 = vrot.slane %v1779_v37, 4  ;;  %v533_v1 = vpop.f32.mrf.mxu1  ;;  %v650_v45 = vpop.f32.mrf.mxu0  ;;  %1195 = vmatprep.mubr.f32.mxu0 %v2511_v42 }
 0x180   :  { %v1781_v9 = vmax.f32 %v1779_v37, %v1780_v47  ;;  %v2294_v46 = vpop.f32.mrf.mxu1  ;;  %v652_v62 = vpop.f32.mrf.mxu0 }
 0x182   :  { %v610_v7 = vpop.f32.mrf.mxu1  ;;  %v653_v6 = vpop.f32.mrf.mxu0  ;;  %v1782_v2 = vrot.slane %v1781_v9, 2 }
 0x183   :  { %v611_v32 = vadd.f32 %v610_v7, %v570_v31 }
 0x184   :  { %v2299_v27 = vpop.f32.mrf.mxu1  ;;  %v654_v23 = vpop.f32.mrf.mxu0  ;;  %v1783_v10 = vmax.f32 %v1781_v9, %v1782_v2 }
 0x185   :  { %v1786_v35 = vsel %vm1100_vm1, %v611_v32, -inf  ;;  %2232 = vmatmul.mubr.msk.f32.gmra.mxu0 %vm1100_vm1, %v611_v32 }
 0x186   :  { %v1787_v22 = vrot.slane %v1786_v35, 4  ;;  %v613_v41 = vpop.f32.mrf.mxu1  ;;  %v730_v38 = vpop.f32.mrf.mxu0  ;;  %1201 = vmatprep.mubr.f32.mxu0 %v2511_v42  ;;  %v1784_v60 = vrot.slane %v1783_v10, 1 }
 0x187   :  { %v1379_v41 = vld [vmem:[%s3764_s7 + $0x28] sm:$0xff] }
 0x188   :  { %v1788_v61 = vmax.f32 %v1786_v35, %v1787_v22  ;;  %v2300_v21 = vpop.f32.mrf.mxu1  ;;  %v732_v52 = vpop.f32.mrf.mxu0  ;;  %v1785_v51 = vmax.f32 %v1783_v10, %v1784_v60  ;;  %v1381_v35 = vld [vmem:[%s3764_s7 + $0x38] sm:$0xff]  ;;  %v1380_v22 = vld [vmem:[%s3764_s7 + $0x30] sm:$0xff]  ;;  %v1391_v60 = vld [vmem:[%s3764_s7 + $0x88] sm:$0xff] }
 0x189   :  { %1438 = vmatpush1.msra.mxu1 %v1381_v35  ;;  %v1377_v10 = vld [vmem:[%s3764_s7 + $0x18] sm:$0xff]  ;;  %v1375_v21 = vld [vmem:[%s3764_s7 + $0x8] sm:$0xff]  ;;  %v1374_v52 = vld [vmem:[%s3764_s7] sm:$0xff] }
 0x18a   :  { %v1789_v44 = vrot.slane %v1788_v61, 2  ;;  %v690_v13 = vpop.f32.mrf.mxu1  ;;  %v733_v57 = vpop.f32.mrf.mxu0  ;;  %1439 = vmatprep.subr.mxu1 %v2511_v42 }
 0x18b   :  { %v691_v53 = vadd.f32 %v690_v13, %v650_v45  ;;  %1440 = vmatpush1.msra.mxu1 %v1380_v22  ;;  %v1394_v13 = vld [vmem:[%s3764_s7 + $0xa0] sm:$0xff]  ;;  %v1393_v57 = vld [vmem:[%s3764_s7 + $0x98] sm:$0xff] }
 0x18c   :  { %v1790_v26 = vmax.f32 %v1788_v61, %v1789_v44  ;;  %v2305_v25 = vpop.f32.mrf.mxu1  ;;  %v734_v39 = vpop.f32.mrf.mxu0  ;;  %1441 = vmatprep.subr.mxu1 %v2511_v42  ;;  %v1376_v61 = vld [vmem:[%s3764_s7 + $0x10] sm:$0xff]  ;;  %v1395_v44 = vld [vmem:[%s3764_s7 + $0xa8] sm:$0xff] }
 0x18d   :  { %2233 = vmatmul.mubr.msk.f32.gmra.mxu0 %vm1100_vm1, %v691_v53  ;;  %1442 = vmatpush1.msra.mxu1 %v1379_v41  ;;  %v1392_v53 = vld [vmem:[%s3764_s7 + $0x90] sm:$0xff]  ;;  %v2513_v25 = vmov 0   ;;  %v1343_v41 = vld [vmem:[%s3770_s8 + $0x8] sm:$0xff] }
 0x18e   :  { %v1791_v54 = vrot.slane %v1790_v26, 1  ;;  %v693_v56 = vpop.f32.mrf.mxu1  ;;  %v810_v16 = vpop.f32.mrf.mxu0  ;;  %1207 = vmatprep.mubr.f32.mxu0 %v2511_v42  ;;  %1443 = vmatprep.subr.mxu1 %v2511_v42  ;;  %v1556_v39 = vld [vmem:[%s3765_s9 + $0x30] sm:$0xff] }
 0x18f   :  { %2382 = vset.pattern.permute.xlu1 %v2513_v25  ;;  %2381 = vset.pattern.permute.xlu0 %v2513_v25  ;;  %v1554_v56 = vld [vmem:[%s3765_s9 + $0x20] sm:$0xff] }
 0x190   :  { %v1792_v5 = vmax.f32 %v1790_v26, %v1791_v54  ;;  %v2306_v29 = vpop.f32.mrf.mxu1  ;;  %v812_v19 = vpop.f32.mrf.mxu0  ;;  %v1390_v26 = vld [vmem:[%s3764_s7 + $0x80] sm:$0xff]  ;;  %1590 = vperm.xlu1 %2382, %v1556_v39   ;;  %v1555_v54 = vld [vmem:[%s3765_s9 + $0x28] sm:$0xff] }
 0x191   :  { %v1776_v29 = vld [vmem:[%s3766_s4 + $0x8] sm:$0x7] }
 0x192   :  { %v770_v18 = vpop.f32.mrf.mxu1  ;;  %v813_v59 = vpop.f32.mrf.mxu0  ;;  %v3322_v4 = vsel %vm1799_vm2, %v1792_v5, %v1785_v51  ;;  %v1557_v51 = vld [vmem:[%s3765_s9 + $0x38] sm:$0xff]  ;;  %v1552_v5 = vld [vmem:[%s3765_s9 + $0x10] sm:$0xff]  ;;  %v1551_v19 = vld [vmem:[%s3765_s9 + $0x8] sm:$0xff] }
 0x193   :  { %v771_v43 = vadd.f32 %v770_v18, %v730_v38  ;;  %v1378_v38 = vld [vmem:[%s3764_s7 + $0x20] sm:$0xff]  ;;  %1595 = vperm.xlu0 %2381, %v1557_v51   ;;  %v1778_v18 = vld [vmem:[%s3767_s5 + $0x8] sm:$0x7] }
 0x194   :  { %v2311_v11 = vpop.f32.mrf.mxu1  ;;  %v814_v48 = vpop.f32.mrf.mxu0  ;;  %1444 = vmatpush1.msra.mxu1 %v1378_v38  ;;  %1585 = vperm.xlu1 %2382, %v1555_v54   ;;  %v1550_v59 = vld [vmem:[%s3765_s9] sm:$0xff] }
 0x195   :  { %2234 = vmatmul.mubr.msk.f32.gmra.mxu0 %vm1100_vm1, %v771_v43  ;;  %1445 = vmatprep.subr.mxu1 %v2511_v42  ;;  %v1775_v43 = vld [vmem:[%s3766_s4] sm:$0xff]  ;;  %v1240_v48 = vlaneseq }
 0x196   :  { %v773_v58 = vpop.f32.mrf.mxu1  ;;  %v890_v55 = vpop.f32.mrf.mxu0  ;;  %1213 = vmatprep.mubr.f32.mxu0 %v2511_v42  ;;  %1446 = vmatpush1.msra.mxu1 %v1377_v10  ;;  %v1777_v11 = vld [vmem:[%s3767_s5] sm:$0xff] }
 0x197   :  { %1447 = vmatprep.subr.mxu1 %v2511_v42  ;;  %1899 = vperm.xlu0 %2381, %v1776_v29   ;;  %v1241_v58 = vshrl.u32 %v1240_v48, 7 }
 0x198   :  { %v2312_v12 = vpop.f32.mrf.mxu1  ;;  %v892_v28 = vpop.f32.mrf.mxu0  ;;  %1448 = vmatpush1.msra.mxu1 %v1376_v61  ;;  %1580 = vperm.xlu1 %2382, %v1554_v56  }
 0x199   :  { %1449 = vmatprep.subr.mxu1 %v2511_v42  ;;  %v1238_v12 = vld [vmem:[%s3768_s2] sm:$0x3]  ;;  %v3432_v28 = vsub.s32 1, %v1241_v58 }
 0x19a   :  { %v850_v20 = vpop.f32.mrf.mxu1  ;;  %v893_v36 = vpop.f32.mrf.mxu0  ;;  %1450 = vmatpush1.msra.mxu1 %v1375_v21  ;;  %v1342_v21 = vld [vmem:[%s3770_s8] sm:$0xff] }
 0x19b   :  { %v851_v50 = vadd.f32 %v850_v20, %v810_v16  ;;  %1451 = vmatprep.subr.mxu1 %v2511_v42  ;;  %v1553_v16 = vld [vmem:[%s3765_s9 + $0x18] sm:$0xff]  ;;  %1917 = vperm.xlu0 %2381, %v1778_v18   ;;  %v1282_v36 = vld [vmem:[%s3769_s3] sm:$0x3] }
 0x19c   :  { %v2317_v30 = vpop.f32.mrf.mxu1  ;;  %v894_v8 = vpop.f32.mrf.mxu0  ;;  %1452 = vmatpush1.msra.mxu1 %v1374_v52  ;;  %1575 = vperm.xlu1 %2382, %v1553_v16   ;;  %v1345_v16 = vld [vmem:[%s3770_s8 + $0x18] sm:$0xff] }
 0x19d   :  { %2235 = vmatmul.mubr.msk.f32.gmra.mxu0 %vm1100_vm1, %v851_v50  ;;  %1473 = vmatprep.subr.mxu1 %v2511_v42  ;;  %v3441_v50 = vrot.slane %v1238_v12, %v3432_v28 }
 0x19e   :  { %v853_v63 = vpop.f32.mrf.mxu1  ;;  %v970_v33 = vpop.f32.mrf.mxu0  ;;  %1219 = vmatprep.mubr.f32.mxu0 %v2511_v42  ;;  %1474 = vmatpush2.msra.mxu1 %v1395_v44 }
 0x19f   :  { %1475 = vmatprep.subr.mxu1 %v2511_v42 }
 0x1a0   :  { %v2318_v17 = vpop.f32.mrf.mxu1  ;;  %v972_v14 = vpop.f32.mrf.mxu0  ;;  %1476 = vmatpush2.msra.mxu1 %v1394_v13  ;;  %1570 = vperm.xlu1 %2382, %v1552_v5  }
 0x1a1   :  { %1477 = vmatprep.subr.mxu1 %v2511_v42 }
 0x1a2   :  { %v930_v31 = vpop.f32.mrf.mxu1  ;;  %v973_v34 = vpop.f32.mrf.mxu0  ;;  %1478 = vmatpush2.msra.mxu1 %v1393_v57 }
 0x1a3   :  { %v931_v49 = vadd.f32 %v930_v31, %v890_v55  ;;  %1479 = vmatprep.subr.mxu1 %v2511_v42  ;;  %v3427_v55 = vsub.s32 0, %v1241_v58  ;;  %v3449_v31 = vrot.slane %v1282_v36, %v3432_v28 }
 0x1a4   :  { %v2323_v15 = vpop.f32.mrf.mxu1  ;;  %v974_v40 = vpop.f32.mrf.mxu0  ;;  %1480 = vmatpush2.msra.mxu1 %v1392_v53  ;;  %1565 = vperm.xlu1 %2382, %v1551_v19   ;;  %v1344_v19 = vld [vmem:[%s3770_s8 + $0x10] sm:$0xff] }
 0x1a5   :  { %2236 = vmatmul.mubr.msk.f32.gmra.mxu0 %vm1100_vm1, %v931_v49  ;;  %1481 = vmatprep.subr.mxu1 %v2511_v42  ;;  %v3435_v20 = vrot.slane %v1238_v12, %v3427_v55  ;;  %v3445_v63 = vrot.slane %v1282_v36, %v3427_v55 }
 0x1a6   :  { %v933_v24 = vpop.f32.mrf.mxu1  ;;  %v1050_v0 = vpop.f32.mrf.mxu0  ;;  %1225 = vmatprep.mubr.f32.mxu0 %v2511_v42  ;;  %1482 = vmatpush2.msra.mxu1 %v1391_v60 }
 0x1a7   :  { %1483 = vmatprep.subr.mxu1 %v2511_v42 }
 0x1a8   :  { %v2324_v3 = vpop.f32.mrf.mxu1  ;;  %v1052_v37 = vpop.f32.mrf.mxu0  ;;  %1484 = vmatpush2.msra.mxu1 %v1390_v26  ;;  %1560 = vperm.xlu1 %2382, %v1550_v59  }
 0x1a9   :  { %1978 = vmatprep.subr.mxu1 %v2511_v42 }
 0x1aa   :  { %v1010_v47 = vpop.f32.mrf.mxu1  ;;  %v1053_v1 = vpop.f32.mrf.mxu0 }
 0x1ab   :  { %v1011_v45 = vadd.f32 %v1010_v47, %v970_v33 }
 0x1ac   :  { %v2329_v9 = vpop.f32.mrf.mxu1  ;;  %v1054_v46 = vpop.f32.mrf.mxu0  ;;  %1894 = vperm.xlu1 %2382, %v1775_v43  }
 0x1ad   :  { %2237 = vmatmul.mubr.msk.f32.gmra.mxu0 %vm1100_vm1, %v1011_v45 }
 0x1ae   :  { %v1013_v62 = vpop.f32.mrf.mxu1  ;;  %1231 = vmatprep.mubr.f32.mxu0 %v2511_v42 }
 0x1b0   :  { %v2330_v7 = vpop.f32.mrf.mxu1  ;;  %1912 = vperm.xlu1 %2382, %v1777_v11  }
 0x1b2   :  { %v1090_v6 = vpop.f32.mrf.mxu1 }
 0x1b3   :  { %v1091_v32 = vadd.f32 %v1090_v6, %v1050_v0 }
 0x1b4   :  { %v2335_v2 = vpop.f32.mrf.mxu1 }
 0x1b5   :  { %2238 = vmatmul.mubr.msk.f32.gmra.mxu0 %vm1100_vm1, %v1091_v32 }
 0x1b6   :  { %v1093_v27 = vpop.f32.mrf.mxu1  ;;  %2353 = vmatprep.mubr.msk.f32.mxu0 %vm2512_vm0, %v2511_v42 }
 0x1b8   :  { %v2336_v23 = vpop.f32.mrf.mxu1 }
 0x23d   :  { %v1191_v30 = vpop.f32.mrf.mxu0 }
 0x23e   :  { %v1250_v8 = vsub.f32 %v1191_v30, %v3435_v20 }
 0x23f   :  { %v1193_v33 = vpop.f32.mrf.mxu0 }
 0x240   :  { %v1266_v17 = vmul.f32 %v1250_v8, %v1250_v8  ;;  %v1251_v14 = vsub.f32 %v1193_v33, %v3441_v50 }
 0x242   :  { %v1294_v34 = vmul.f32 %v3445_v63, %v1266_v17  ;;  %v1267_v49 = vmul.f32 %v1251_v14, %v1251_v14  ;;  %v1347_v17 = vld [vmem:[%s3770_s8 + $0x28] sm:$0xff] }
 0x244   :  { %v1310_v15 = vmul.f32 1.442695, %v1294_v34  ;;  %v1295_v40 = vmul.f32 %v3449_v31, %v1267_v49 }
 0x245   :  { %v1197_v24 = vpop.f32.mrf.mxu0 }
 0x246   :  { %v1312_v0 = vmul.f32 1.442695, %v1295_v40  ;;  %v1252_v3 = vsub.f32 %v1197_v24, %v3435_v20  ;;  %2431 = vpow2.f32 %v1310_v15  ;;  %v1346_v15 = vld [vmem:[%s3770_s8 + $0x20] sm:$0xff] }
 0x247   :  { %v1199_v37 = vpop.f32.mrf.mxu0 }
 0x248   :  { %2433 = vpow2.f32 %v1312_v0  ;;  %v1268_v47 = vmul.f32 %v1252_v3, %v1252_v3  ;;  %v1253_v1 = vsub.f32 %v1199_v37, %v3441_v50 }
 0x24a   :  { %v1296_v45 = vmul.f32 %v3445_v63, %v1268_v47  ;;  %v1269_v9 = vmul.f32 %v1253_v1, %v1253_v1 }
 0x24c   :  { %v1314_v46 = vmul.f32 1.442695, %v1296_v45  ;;  %v1297_v62 = vmul.f32 %v3449_v31, %v1269_v9 }
 0x24d   :  { %v1203_v7 = vpop.f32.mrf.mxu0 }
 0x24e   :  { %v1316_v6 = vmul.f32 1.442695, %v1297_v62  ;;  %v1254_v32 = vsub.f32 %v1203_v7, %v3435_v20  ;;  %2435 = vpow2.f32 %v1314_v46  ;;  %v1349_v7 = vld [vmem:[%s3770_s8 + $0x38] sm:$0xff] }
 0x24f   :  { %v1205_v2 = vpop.f32.mrf.mxu0 }
 0x250   :  { %2437 = vpow2.f32 %v1316_v6  ;;  %v1270_v27 = vmul.f32 %v1254_v32, %v1254_v32  ;;  %v1255_v23 = vsub.f32 %v1205_v2, %v3441_v50 }
 0x252   :  { %v1298_v35 = vmul.f32 %v3445_v63, %v1270_v27  ;;  %v1271_v22 = vmul.f32 %v1255_v23, %v1255_v23  ;;  %v1348_v27 = vld [vmem:[%s3770_s8 + $0x30] sm:$0xff] }
 0x253   :  { %v2432_v38 = vpop.eup %2431 }
 0x254   :  { %v1318_v10 = vmul.f32 1.442695, %v1298_v35  ;;  %v1299_v61 = vmul.f32 %v3449_v31, %v1271_v22  ;;  %v1358_v26 = vmul.f32 %v2432_v38, %v1342_v21 }
 0x255   :  { %v2434_v52 = vpop.eup %2433  ;;  %v1209_v44 = vpop.f32.mrf.mxu0 }
 0x256   :  { %v1320_v13 = vmul.f32 1.442695, %v1299_v61  ;;  %v1256_v57 = vsub.f32 %v1209_v44, %v3435_v20  ;;  %v1359_v53 = vmul.f32 %v2434_v52, %v1343_v41  ;;  %2439 = vpow2.f32 %v1318_v10 }
 0x257   :  { %v1211_v60 = vpop.f32.mrf.mxu0 }
 0x258   :  { %2441 = vpow2.f32 %v1320_v13  ;;  %v1272_v25 = vmul.f32 %v1256_v57, %v1256_v57  ;;  %v1257_v39 = vsub.f32 %v1211_v60, %v3441_v50  ;;  %2239 = vmatprep.mubr.msk.f32.mxu1 %vm1396_vm3, %v1359_v53  ;;  %v1351_v57 = vld [vmem:[%s3770_s8 + $0x48] sm:$0xff] }
 0x259   :  { %1486 = vmatmul.mubr.f32.vlgmr.msra.gmra.mxu1 %v1358_v26 }
 0x25a   :  { %v1300_v54 = vmul.f32 %v3445_v63, %v1272_v25  ;;  %v1273_v56 = vmul.f32 %v1257_v39, %v1257_v39  ;;  %v1350_v25 = vld [vmem:[%s3770_s8 + $0x40] sm:$0xff] }
 0x25b   :  { %v2436_v51 = vpop.eup %2435 }
 0x25c   :  { %v1322_v5 = vmul.f32 1.442695, %v1300_v54  ;;  %v1301_v29 = vmul.f32 %v3449_v31, %v1273_v56  ;;  %v1360_v12 = vmul.f32 %v2436_v51, %v1344_v19 }
 0x25d   :  { %v2438_v18 = vpop.eup %2437  ;;  %v1215_v59 = vpop.f32.mrf.mxu0 }
 0x25e   :  { %v1324_v43 = vmul.f32 1.442695, %v1301_v29  ;;  %v1258_v11 = vsub.f32 %v1215_v59, %v3435_v20  ;;  %v1361_v48 = vmul.f32 %v2438_v18, %v1345_v16  ;;  %2443 = vpow2.f32 %v1322_v5 }
 0x25f   :  { %v1217_v58 = vpop.f32.mrf.mxu0 }
 0x260   :  { %2445 = vpow2.f32 %v1324_v43  ;;  %v1274_v36 = vmul.f32 %v1258_v11, %v1258_v11  ;;  %v1259_v30 = vsub.f32 %v1217_v58, %v3441_v50  ;;  %2240 = vmatprep.mubr.msk.f32.mxu1 %vm1396_vm3, %v1361_v48  ;;  %v1353_v11 = vld [vmem:[%s3770_s8 + $0x58] sm:$0xff] }
 0x261   :  { %1491 = vmatmul.mubr.f32.gmra.mxu1 %v1360_v12  ;;  %v1352_v12 = vld [vmem:[%s3770_s8 + $0x50] sm:$0xff] }
 0x262   :  { %v1302_v8 = vmul.f32 %v3445_v63, %v1274_v36  ;;  %v1275_v33 = vmul.f32 %v1259_v30, %v1259_v30 }
 0x263   :  { %v2440_v14 = vpop.eup %2439 }
 0x264   :  { %v1326_v34 = vmul.f32 1.442695, %v1302_v8  ;;  %v1303_v49 = vmul.f32 %v3449_v31, %v1275_v33  ;;  %v1362_v1 = vmul.f32 %v2440_v14, %v1346_v15 }
 0x265   :  { %v2442_v40 = vpop.eup %2441  ;;  %v1221_v24 = vpop.f32.mrf.mxu0 }
 0x266   :  { %v1328_v0 = vmul.f32 1.442695, %v1303_v49  ;;  %v1260_v3 = vsub.f32 %v1221_v24, %v3435_v20  ;;  %v1363_v37 = vmul.f32 %v2442_v40, %v1347_v17  ;;  %2447 = vpow2.f32 %v1326_v34  ;;  %v1357_v49 = vld [vmem:[%s3770_s8 + $0x78] sm:$0xff]  ;;  %v1356_v40 = vld [vmem:[%s3770_s8 + $0x70] sm:$0xff] }
 0x267   :  { %v1223_v47 = vpop.f32.mrf.mxu0 }
 0x268   :  { %2449 = vpow2.f32 %v1328_v0  ;;  %v1276_v45 = vmul.f32 %v1260_v3, %v1260_v3  ;;  %v1261_v9 = vsub.f32 %v1223_v47, %v3441_v50  ;;  %2241 = vmatprep.mubr.msk.f32.mxu1 %vm1396_vm3, %v1363_v37  ;;  %v3540_v37 = vld [vmem:[%s3771_s13 + $0x78] sm:$0xff]  ;;  %v3546_v47 = vld [vmem:[%s3771_s13 + $0x70] sm:$0xff] }
 0x269   :  { %1496 = vmatmul.mubr.f32.gmra.mxu1 %v1362_v1  ;;  %v3553_v1 = vld [vmem:[%s3771_s13 + $0x68] sm:$0xff] }
 0x26a   :  { %v1304_v46 = vmul.f32 %v3445_v63, %v1276_v45  ;;  %v1277_v62 = vmul.f32 %v1261_v9, %v1261_v9  ;;  %1979 = vmatpush1.msra.mxu1 %v3540_v37  ;;  %v3560_v45 = vld [vmem:[%s3771_s13 + $0x60] sm:$0xff]  ;;  %v3567_v9 = vld [vmem:[%s3771_s13 + $0x58] sm:$0xff] }
 0x26b   :  { %v2444_v6 = vpop.eup %2443  ;;  %1980 = vmatprep.subr.mxu1 %v2511_v42 }
 0x26c   :  { %v1330_v32 = vmul.f32 1.442695, %v1304_v46  ;;  %v1305_v2 = vmul.f32 %v3449_v31, %v1277_v62  ;;  %v1364_v61 = vmul.f32 %v2444_v6, %v1348_v27  ;;  %1981 = vmatpush1.msra.mxu1 %v3546_v47 }
 0x26d   :  { %v2446_v23 = vpop.eup %2445  ;;  %v1227_v35 = vpop.f32.mrf.mxu0  ;;  %1982 = vmatprep.subr.mxu1 %v2511_v42 }
 0x26e   :  { %v1332_v22 = vmul.f32 1.442695, %v1305_v2  ;;  %v1262_v41 = vsub.f32 %v1227_v35, %v3435_v20  ;;  %v1365_v38 = vmul.f32 %v2446_v23, %v1349_v7  ;;  %2451 = vpow2.f32 %v1330_v32  ;;  %1983 = vmatpush1.msra.mxu1 %v3553_v1 }
 0x26f   :  { %v1229_v10 = vpop.f32.mrf.mxu0  ;;  %1984 = vmatprep.subr.mxu1 %v2511_v42 }
 0x270   :  { %2453 = vpow2.f32 %v1332_v22  ;;  %v1278_v21 = vmul.f32 %v1262_v41, %v1262_v41  ;;  %v1263_v52 = vsub.f32 %v1229_v10, %v3441_v50  ;;  %2242 = vmatprep.mubr.msk.f32.mxu1 %vm1396_vm3, %v1365_v38  ;;  %1985 = vmatpush1.msra.mxu1 %v3560_v45  ;;  %v1591_v41 = vpop.permute.xlu1 %1590 }
 0x271   :  { %1501 = vmatmul.mubr.f32.gmra.mxu1 %v1364_v61  ;;  %1986 = vmatprep.subr.mxu1 %v2511_v42 }
 0x272   :  { %v1306_v44 = vmul.f32 %v3445_v63, %v1278_v21  ;;  %v1279_v13 = vmul.f32 %v1263_v52, %v1263_v52  ;;  %1987 = vmatpush1.msra.mxu1 %v3567_v9 }
 0x273   :  { %v2448_v53 = vpop.eup %2447  ;;  %1988 = vmatprep.subr.mxu1 %v2511_v42 }
 0x274   :  { %v1334_v60 = vmul.f32 1.442695, %v1306_v44  ;;  %v1307_v26 = vmul.f32 %v3449_v31, %v1279_v13  ;;  %v1366_v29 = vmul.f32 %v2448_v53, %v1350_v25  ;;  %v1586_v61 = vpop.permute.xlu1 %1585 }
 0x275   :  { %v2450_v39 = vpop.eup %2449  ;;  %v1233_v54 = vpop.f32.mrf.mxu0 }
 0x276   :  { %v1336_v56 = vmul.f32 1.442695, %v1307_v26  ;;  %v1264_v16 = vsub.f32 %v1233_v54, %v3435_v20  ;;  %v1367_v51 = vmul.f32 %v2450_v39, %v1351_v57  ;;  %2455 = vpow2.f32 %v1334_v60 }
 0x277   :  { %v1235_v5 = vpop.f32.mrf.mxu0 }
 0x278   :  { %2457 = vpow2.f32 %v1336_v56  ;;  %v1280_v19 = vmul.f32 %v1264_v16, %v1264_v16  ;;  %v1265_v18 = vsub.f32 %v1235_v5, %v3441_v50  ;;  %2243 = vmatprep.mubr.msk.f32.mxu1 %vm1396_vm3, %v1367_v51  ;;  %v1581_v44 = vpop.permute.xlu1 %1580  ;;  %v1596_v56 = vpop.permute.xlu0 %1595 }
 0x279   :  { %1506 = vmatmul.mubr.f32.gmra.mxu1 %v1366_v29 }
 0x27a   :  { %v1308_v59 = vmul.f32 %v3445_v63, %v1280_v19  ;;  %v1281_v43 = vmul.f32 %v1265_v18, %v1265_v18  ;;  %v1355_v63 = vld [vmem:[%s3770_s8 + $0x68] sm:$0xff] }
 0x27b   :  { %v2452_v48 = vpop.eup %2451 }
 0x27c   :  { %v1338_v20 = vmul.f32 1.442695, %v1308_v59  ;;  %v1309_v58 = vmul.f32 %v3449_v31, %v1281_v43  ;;  %v1368_v8 = vmul.f32 %v2452_v48, %v1352_v12  ;;  %v1354_v31 = vld [vmem:[%s3770_s8 + $0x60] sm:$0xff]  ;;  %v1576_v26 = vpop.permute.xlu1 %1575 }
 0x27d   :  { %v2454_v36 = vpop.eup %2453 }
 0x27e   :  { %v1340_v50 = vmul.f32 1.442695, %v1309_v58  ;;  %v1369_v30 = vmul.f32 %v2454_v36, %v1353_v11  ;;  %2459 = vpow2.f32 %v1338_v20 }
 0x280   :  { %2461 = vpow2.f32 %v1340_v50  ;;  %2244 = vmatprep.mubr.msk.f32.mxu1 %vm1396_vm3, %v1369_v30  ;;  %v1571_v51 = vpop.permute.xlu1 %1570 }
 0x281   :  { %1511 = vmatmul.mubr.f32.gmra.mxu1 %v1368_v8 }
 0x283   :  { %v2456_v33 = vpop.eup %2455 }
 0x284   :  { %v1370_v34 = vmul.f32 %v2456_v33, %v1354_v31  ;;  %v1566_v11 = vpop.permute.xlu1 %1565 }
 0x285   :  { %v2458_v17 = vpop.eup %2457 }
 0x286   :  { %v1371_v14 = vmul.f32 %v2458_v17, %v1355_v63 }
 0x288   :  { %2245 = vmatprep.mubr.msk.f32.mxu1 %vm1396_vm3, %v1371_v14  ;;  %v1561_v14 = vpop.permute.xlu1 %1560 }
 0x289   :  { %1516 = vmatmul.mubr.f32.gmra.mxu1 %v1370_v34 }
 0x28b   :  { %v2460_v15 = vpop.eup %2459 }
 0x28c   :  { %v1372_v3 = vmul.f32 %v2460_v15, %v1356_v40 }
 0x28d   :  { %v2462_v24 = vpop.eup %2461 }
 0x28e   :  { %v1373_v0 = vmul.f32 %v2462_v24, %v1357_v49 }
 0x290   :  { %2246 = vmatprep.mubr.msk.f32.mxu1 %vm1396_vm3, %v1373_v0 }
 0x291   :  { %1521 = vmatmul.mubr.f32.gmra.mxu1 %v1372_v3 }
 0x319   :  { %v3580_v46 = vpop.f32.mrf.mxu1 }
 0x31a   :  { %v1526_v19 = vmax.f32 %v3580_v46, 1e-10  ;;  %v1598_v24 = vmul.f32 %v1561_v14, %v3580_v46  ;;  %v1895_v14 = vpop.permute.xlu1 %1894 }
 0x31b   :  { %v1489_v62 = vpop.f32.mrf.mxu1 }
 0x321   :  { %v1492_v7 = vpop.f32.mrf.mxu1 }
 0x322   :  { %v1527_v5 = vmax.f32 %v1492_v7, 1e-10  ;;  %v1599_v34 = vmul.f32 %v1566_v11, %v1492_v7  ;;  %v1948_v11 = vld [vmem:[%s3771_s13] sm:$0xff] }
 0x323   :  { %v1494_v6 = vpop.f32.mrf.mxu1 }
 0x324   :  { %v1607_v6 = vmax.f32 %v1599_v34, 1e-10  ;;  %v1900_v34 = vpop.permute.xlu0 %1899 }
 0x329   :  { %v1497_v32 = vpop.f32.mrf.mxu1 }
 0x32a   :  { %v1528_v16 = vmax.f32 %v1497_v32, 1e-10  ;;  %v1600_v63 = vmul.f32 %v1571_v51, %v1497_v32  ;;  %v1795_v51 = vld [vmem:[%s3774_s11 + $0x10] sm:$0xff] }
 0x32b   :  { %v1499_v2 = vpop.f32.mrf.mxu1 }
 0x32c   :  { %v1608_v0 = vmax.f32 %v1600_v63, 1e-10  ;;  %v1606_v2 = vmax.f32 %v1598_v24, 1e-10 }
 0x331   :  { %v1502_v27 = vpop.f32.mrf.mxu1 }
 0x332   :  { %v1529_v54 = vmax.f32 %v1502_v27, 1e-10  ;;  %v1601_v36 = vmul.f32 %v1576_v26, %v1502_v27 }
 0x333   :  { %v1504_v23 = vpop.f32.mrf.mxu1 }
 0x334   :  { %v1609_v49 = vmax.f32 %v1601_v36, 1e-10  ;;  %v1967_v36 = vld [vmem:[%s3771_s13 + $0x98] sm:$0xff] }
 0x339   :  { %v1507_v35 = vpop.f32.mrf.mxu1 }
 0x33a   :  { %v1530_v39 = vmax.f32 %v1507_v35, 1e-10  ;;  %v1602_v20 = vmul.f32 %v1581_v44, %v1507_v35 }
 0x33b   :  { %v1509_v22 = vpop.f32.mrf.mxu1 }
 0x33c   :  { %v1610_v33 = vmax.f32 %v1602_v20, 1e-10  ;;  %v1970_v20 = vld [vmem:[%s3771_s13 + $0xb0] sm:$0xff] }
 0x341   :  { %v1512_v38 = vpop.f32.mrf.mxu1 }
 0x342   :  { %v1531_v53 = vmax.f32 %v1512_v38, 1e-10  ;;  %v1603_v59 = vmul.f32 %v1586_v61, %v1512_v38 }
 0x343   :  { %v1514_v10 = vpop.f32.mrf.mxu1 }
 0x344   :  { %v1611_v50 = vmax.f32 %v1603_v59, 1e-10  ;;  %v1950_v59 = vld [vmem:[%s3771_s13 + $0x10] sm:$0xff] }
 0x349   :  { %v1517_v21 = vpop.f32.mrf.mxu1 }
 0x34a   :  { %v1532_v13 = vmax.f32 %v1517_v21, 1e-10  ;;  %v1604_v18 = vmul.f32 %v1591_v41, %v1517_v21  ;;  %v1630_v41 = vld [vmem:[%s3773_s10] sm:$0xff] }
 0x34b   :  { %v1519_v52 = vpop.f32.mrf.mxu1 }
 0x34c   :  { %2463 = vlog2.f32 %v1532_v13  ;;  %v1612_v58 = vmax.f32 %v1604_v18, 1e-10  ;;  %v1951_v18 = vld [vmem:[%s3771_s13 + $0x18] sm:$0xff] }
 0x351   :  { %v1522_v57 = vpop.f32.mrf.mxu1 }
 0x352   :  { %v1533_v60 = vmax.f32 %v1522_v57, 1e-10  ;;  %v1605_v29 = vmul.f32 %v1596_v56, %v1522_v57 }
 0x353   :  { %v1524_v25 = vpop.f32.mrf.mxu1 }
 0x354   :  { %2465 = vlog2.f32 %v1533_v60  ;;  %v1613_v43 = vmax.f32 %v1605_v29, 1e-10  ;;  %v1793_v29 = vld [vmem:[%s3774_s11] sm:$0xff] }
 0x355   :  { %2467 = vlog2.f32 %v1531_v53 }
 0x356   :  { %2469 = vlog2.f32 %v1530_v39 }
 0x357   :  { %2471 = vlog2.f32 %v1529_v54 }
 0x358   :  { %2473 = vlog2.f32 %v1528_v16  ;;  %v1796_v16 = vld [vmem:[%s3774_s11 + $0x18] sm:$0xff] }
 0x359   :  { %2475 = vlog2.f32 %v1527_v5  ;;  %v2464_v48 = vpop.eup %2463  ;;  %v1794_v5 = vld [vmem:[%s3774_s11 + $0x8] sm:$0xff] }
 0x35a   :  { %2477 = vlog2.f32 %v1526_v19  ;;  %v1547_v31 = vmul.f32 0.6931472, %v2464_v48  ;;  %v1952_v19 = vld [vmem:[%s3771_s13 + $0x20] sm:$0xff]  ;;  %v1971_v48 = vld [vmem:[%s3771_s13 + $0xb8] sm:$0xff] }
 0x35b   :  { %2479 = vlog2.f32 %v1613_v43  ;;  %v1949_v43 = vld [vmem:[%s3771_s13 + $0x8] sm:$0xff] }
 0x35c   :  { %2481 = vlog2.f32 %v1612_v58  ;;  %v1969_v58 = vld [vmem:[%s3771_s13 + $0xa8] sm:$0xff] }
 0x35d   :  { %2483 = vlog2.f32 %v1611_v50  ;;  %v1966_v50 = vld [vmem:[%s3771_s13 + $0x90] sm:$0xff] }
 0x35e   :  { %2485 = vlog2.f32 %v1610_v33 }
 0x35f   :  { %2487 = vlog2.f32 %v1609_v49 }
 0x360   :  { %2489 = vlog2.f32 %v1608_v0 }
 0x361   :  { %v2466_v12 = vpop.eup %2465  ;;  %2491 = vlog2.f32 %v1607_v6 }
 0x362   :  { %v1549_v30 = vmul.f32 0.6931472, %v2466_v12  ;;  %v2468_v8 = vpop.eup %2467  ;;  %2493 = vlog2.f32 %v1606_v2  ;;  %v1968_v12 = vld [vmem:[%s3771_s13 + $0xa0] sm:$0xff] }
 0x363   :  { %v2470_v17 = vpop.eup %2469  ;;  %v1545_v15 = vmul.f32 0.6931472, %v2468_v8  ;;  %v1964_v8 = vld [vmem:[%s3771_s13 + $0x80] sm:$0xff] }
 0x364   :  { %2338 = vmatpush3.msra.mxu0 %v1549_v30  ;;  %v2472_v40 = vpop.eup %2471  ;;  %v1543_v3 = vmul.f32 0.6931472, %v2470_v17  ;;  %v1965_v30 = vld [vmem:[%s3771_s13 + $0x88] sm:$0xff] }
 0x365   :  { %2339 = vmatprep.subr.mxu0 %v2511_v42  ;;  %v2474_v62 = vpop.eup %2473  ;;  %v1541_v32 = vmul.f32 0.6931472, %v2472_v40 }
 0x366   :  { %2340 = vmatpush3.msra.mxu0 %v1547_v31  ;;  %v2476_v7 = vpop.eup %2475  ;;  %v1539_v27 = vmul.f32 0.6931472, %v2474_v62 }
 0x367   :  { %2341 = vmatprep.subr.mxu0 %v2511_v42  ;;  %v2478_v23 = vpop.eup %2477  ;;  %v1537_v46 = vmul.f32 0.6931472, %v2476_v7 }
 0x368   :  { %2342 = vmatpush3.msra.mxu0 %v1545_v15  ;;  %v2480_v35 = vpop.eup %2479  ;;  %v1535_v22 = vmul.f32 0.6931472, %v2478_v23  ;;  %v1913_v23 = vpop.permute.xlu1 %1912 }
 0x369   :  { %2343 = vmatprep.subr.mxu0 %v2511_v42  ;;  %v2482_v38 = vpop.eup %2481  ;;  %v1629_v10 = vmul.f32 0.6931472, %v2480_v35 }
 0x36a   :  { %2344 = vmatpush3.msra.mxu0 %v1543_v3  ;;  %v2484_v61 = vpop.eup %2483  ;;  %v1627_v21 = vmul.f32 0.6931472, %v2482_v38 }
 0x36b   :  { %2345 = vmatprep.subr.mxu0 %v2511_v42  ;;  %v2486_v52 = vpop.eup %2485  ;;  %v1625_v44 = vmul.f32 0.6931472, %v2484_v61 }
 0x36c   :  { %2346 = vmatpush3.msra.mxu0 %v1541_v32  ;;  %v2488_v13 = vpop.eup %2487  ;;  %v1623_v57 = vmul.f32 0.6931472, %v2486_v52 }
 0x36d   :  { %2347 = vmatprep.subr.mxu0 %v2511_v42  ;;  %v2490_v53 = vpop.eup %2489  ;;  %v1621_v60 = vmul.f32 0.6931472, %v2488_v13 }
 0x36e   :  { %2348 = vmatpush3.msra.mxu0 %v1539_v27  ;;  %v2492_v26 = vpop.eup %2491  ;;  %v1619_v25 = vmul.f32 0.6931472, %v2490_v53 }
 0x36f   :  { %2349 = vmatprep.subr.mxu0 %v2511_v42  ;;  %v2494_v39 = vpop.eup %2493  ;;  %v1617_v54 = vmul.f32 0.6931472, %v2492_v26 }
 0x370   :  { %2350 = vmatpush3.msra.mxu0 %v1537_v46  ;;  %v1615_v56 = vmul.f32 0.6931472, %v2494_v39  ;;  %v1918_v46 = vpop.permute.xlu0 %1917 }
 0x371   :  { %2351 = vmatprep.subr.mxu0 %v2511_v42 }
 0x372   :  { %2352 = vmatpush3.msra.mxu0 %v1535_v22 }
 0x373   :  { %2356 = vmatprep.subr.mxu0 %v2511_v42  ;;  %2354 = vmatmul.mubr.msk.f32.vlgmr.msra.gmra.mxu0 %vm1631_vm4, %v1630_v41 }
 0x374   :  { %2357 = vmatpush3.msra.mxu0 %v1629_v10  ;;  %2372 = vmatprep.mubr.msk.f32.mxu0 %vm2512_vm0, %v2511_v42 }
 0x375   :  { %2358 = vmatprep.subr.mxu0 %v2511_v42 }
 0x376   :  { %2359 = vmatpush3.msra.mxu0 %v1627_v21 }
 0x377   :  { %2360 = vmatprep.subr.mxu0 %v2511_v42 }
 0x378   :  { %2361 = vmatpush3.msra.mxu0 %v1625_v44 }
 0x379   :  { %2362 = vmatprep.subr.mxu0 %v2511_v42 }
 0x37a   :  { %2363 = vmatpush3.msra.mxu0 %v1623_v57 }
 0x37b   :  { %2364 = vmatprep.subr.mxu0 %v2511_v42 }
 0x37c   :  { %2365 = vmatpush3.msra.mxu0 %v1621_v60 }
 0x37d   :  { %2366 = vmatprep.subr.mxu0 %v2511_v42 }
 0x37e   :  { %2367 = vmatpush3.msra.mxu0 %v1619_v25 }
 0x37f   :  { %2368 = vmatprep.subr.mxu0 %v2511_v42 }
 0x380   :  { %2369 = vmatpush3.msra.mxu0 %v1617_v54 }
 0x381   :  { %2370 = vmatprep.subr.mxu0 %v2511_v42 }
 0x382   :  { %2371 = vmatpush3.msra.mxu0 %v1615_v56 }
 0x383   :  { %2373 = vmatmul.mubr.msk.f32.vlgmr.msra.gmra.mxu0 %vm1631_vm4, %v1630_v41  ;;  %1831 = vmatprep.subr.mxu0 %v1796_v16 }
 0x384   :  { %1832 = vmatpush1.msra.mxu0 %v1795_v51  ;;  %1867 = vmatprep.mubr.f32.mxu0 %v2511_v42 }
 0x385   :  { %1833 = vmatprep.subr.mxu0 %v1794_v5 }
 0x386   :  { %1834 = vmatpush1.msra.mxu0 %v1793_v29 }
 0x387   :  { %2249 = vmatmul.mubr.msk.f32.vlgmr.msra.gmra.mxu0 %vm1100_vm1, %v3322_v4  ;;  %2140 = vmatprep.subr.mxu0 %v2511_v42  ;;  %v1958_v4 = vld [vmem:[%s3771_s13 + $0x50] sm:$0xff] }
 0x388   :  { %2141 = vmatpush1.msra.mxu0 %v3540_v37  ;;  %1989 = vmatpush1.msra.mxu1 %v1958_v4  ;;  %v1957_v37 = vld [vmem:[%s3771_s13 + $0x48] sm:$0xff] }
 0x389   :  { %2142 = vmatprep.subr.mxu0 %v2511_v42  ;;  %1990 = vmatprep.subr.mxu1 %v2511_v42 }
 0x38a   :  { %2143 = vmatpush1.msra.mxu0 %v3546_v47  ;;  %1991 = vmatpush1.msra.mxu1 %v1957_v37  ;;  %v1956_v47 = vld [vmem:[%s3771_s13 + $0x40] sm:$0xff] }
 0x38b   :  { %2144 = vmatprep.subr.mxu0 %v2511_v42  ;;  %1992 = vmatprep.subr.mxu1 %v2511_v42 }
 0x38c   :  { %2145 = vmatpush1.msra.mxu0 %v3553_v1  ;;  %1993 = vmatpush1.msra.mxu1 %v1956_v47  ;;  %v1955_v1 = vld [vmem:[%s3771_s13 + $0x38] sm:$0xff] }
 0x38d   :  { %2146 = vmatprep.subr.mxu0 %v2511_v42  ;;  %1994 = vmatprep.subr.mxu1 %v2511_v42 }
 0x38e   :  { %2147 = vmatpush1.msra.mxu0 %v3560_v45  ;;  %1995 = vmatpush1.msra.mxu1 %v1955_v1  ;;  %v1954_v45 = vld [vmem:[%s3771_s13 + $0x30] sm:$0xff] }
 0x38f   :  { %2148 = vmatprep.subr.mxu0 %v2511_v42  ;;  %1996 = vmatprep.subr.mxu1 %v2511_v42 }
 0x390   :  { %2149 = vmatpush1.msra.mxu0 %v3567_v9  ;;  %1997 = vmatpush1.msra.mxu1 %v1954_v45  ;;  %v1953_v9 = vld [vmem:[%s3771_s13 + $0x28] sm:$0xff] }
 0x391   :  { %2150 = vmatprep.subr.mxu0 %v2511_v42  ;;  %1998 = vmatprep.subr.mxu1 %v2511_v42 }
 0x392   :  { %2151 = vmatpush1.msra.mxu0 %v1958_v4  ;;  %1999 = vmatpush1.msra.mxu1 %v1953_v9 }
 0x393   :  { %2152 = vmatprep.subr.mxu0 %v2511_v42  ;;  %2000 = vmatprep.subr.mxu1 %v2511_v42 }
 0x394   :  { %2153 = vmatpush1.msra.mxu0 %v1957_v37  ;;  %2001 = vmatpush1.msra.mxu1 %v1952_v19 }
 0x395   :  { %2154 = vmatprep.subr.mxu0 %v2511_v42  ;;  %2002 = vmatprep.subr.mxu1 %v2511_v42 }
 0x396   :  { %2155 = vmatpush1.msra.mxu0 %v1956_v47  ;;  %2003 = vmatpush1.msra.mxu1 %v1951_v18 }
 0x397   :  { %2156 = vmatprep.subr.mxu0 %v2511_v42  ;;  %2004 = vmatprep.subr.mxu1 %v2511_v42 }
 0x398   :  { %2157 = vmatpush1.msra.mxu0 %v1955_v1  ;;  %2005 = vmatpush1.msra.mxu1 %v1950_v59  ;;  %v1932_v1 = vld [vmem:[%s3775_s12] ss:$2 sm:$0x3] }
 0x399   :  { %2158 = vmatprep.subr.mxu0 %v2511_v42  ;;  %2006 = vmatprep.subr.mxu1 %v2511_v42 }
 0x39a   :  { %2159 = vmatpush1.msra.mxu0 %v1954_v45  ;;  %2007 = vmatpush1.msra.mxu1 %v1949_v43 }
 0x39b   :  { %2160 = vmatprep.subr.mxu0 %v2511_v42  ;;  %2008 = vmatprep.subr.mxu1 %v2511_v42 }
 0x39c   :  { %2161 = vmatpush1.msra.mxu0 %v1953_v9  ;;  %2009 = vmatpush1.msra.mxu1 %v1948_v11  ;;  %v1941_v9 = vrot.slane %v1932_v1, %v3432_v28 }
 0x39d   :  { %2162 = vmatprep.subr.mxu0 %v2511_v42  ;;  %2026 = vmatprep.subr.mxu1 %v2511_v42 }
 0x39e   :  { %2163 = vmatpush1.msra.mxu0 %v1952_v19  ;;  %2027 = vmatpush2.msra.mxu1 %v1971_v48  ;;  %v2252_v19 = vld [vmem:[%s3775_s12 + $0x1] ss:$2 sm:$0x3] }
 0x39f   :  { %2164 = vmatprep.subr.mxu0 %v2511_v42  ;;  %2028 = vmatprep.subr.mxu1 %v2511_v42 }
 0x3a0   :  { %2165 = vmatpush1.msra.mxu0 %v1951_v18  ;;  %2029 = vmatpush2.msra.mxu1 %v1970_v20 }
 0x3a1   :  { %2166 = vmatprep.subr.mxu0 %v2511_v42  ;;  %2030 = vmatprep.subr.mxu1 %v2511_v42 }
 0x3a2   :  { %2167 = vmatpush1.msra.mxu0 %v1950_v59  ;;  %2031 = vmatpush2.msra.mxu1 %v1969_v58  ;;  %v1937_v59 = vrot.slane %v1932_v1, %v3427_v55 }
 0x3a3   :  { %2168 = vmatprep.subr.mxu0 %v2511_v42  ;;  %2032 = vmatprep.subr.mxu1 %v2511_v42 }
 0x3a4   :  { %2169 = vmatpush1.msra.mxu0 %v1949_v43  ;;  %2033 = vmatpush2.msra.mxu1 %v1968_v12 }
 0x3a5   :  { %2170 = vmatprep.subr.mxu0 %v2511_v42  ;;  %2034 = vmatprep.subr.mxu1 %v2511_v42 }
 0x3a6   :  { %2171 = vmatpush1.msra.mxu0 %v1948_v11  ;;  %2035 = vmatpush2.msra.mxu1 %v1967_v36  ;;  %v2103_v11 = vrot.slane %v2252_v19, %v3432_v28 }
 0x3a7   :  { %2188 = vmatprep.subr.mxu0 %v2511_v42  ;;  %2036 = vmatprep.subr.mxu1 %v2511_v42 }
 0x3a8   :  { %2189 = vmatpush2.msra.mxu0 %v1971_v48  ;;  %2037 = vmatpush2.msra.mxu1 %v1966_v50 }
 0x3a9   :  { %2190 = vmatprep.subr.mxu0 %v2511_v42  ;;  %2038 = vmatprep.subr.mxu1 %v2511_v42 }
 0x3aa   :  { %2191 = vmatpush2.msra.mxu0 %v1970_v20  ;;  %2039 = vmatpush2.msra.mxu1 %v1965_v30  ;;  %v2099_v20 = vrot.slane %v2252_v19, %v3427_v55 }
 0x3ab   :  { %2192 = vmatprep.subr.mxu0 %v2511_v42  ;;  %2040 = vmatprep.subr.mxu1 %v2511_v42 }
 0x3ac   :  { %2193 = vmatpush2.msra.mxu0 %v1969_v58  ;;  %2041 = vmatpush2.msra.mxu1 %v1964_v8 }
 0x3ad   :  { %2194 = vmatprep.subr.mxu0 %v2511_v42 }
 0x3ae   :  { %2195 = vmatpush2.msra.mxu0 %v1968_v12 }
 0x3af   :  { %2196 = vmatprep.subr.mxu0 %v2511_v42 }
 0x3b0   :  { %2197 = vmatpush2.msra.mxu0 %v1967_v36 }
 0x3b1   :  { %2198 = vmatprep.subr.mxu0 %v2511_v42 }
 0x3b2   :  { %2199 = vmatpush2.msra.mxu0 %v1966_v50 }
 0x3b3   :  { %2200 = vmatprep.subr.mxu0 %v2511_v42 }
 0x3b4   :  { %2201 = vmatpush2.msra.mxu0 %v1965_v30 }
 0x3b5   :  { %2202 = vmatprep.subr.mxu0 %v2511_v42 }
 0x3b6   :  { %2203 = vmatpush2.msra.mxu0 %v1964_v8 }
 0x433   :  { %v1701_v63 = vpop.f32.mrf.mxu0 }
 0x434   :  { %1877 = vst.msk [vmem:[%s3772_s14] sm:$0xff] %vm1876_vm5, %v1701_v63 }
 0x435   :  { %v2355_v33 = vpop.f32.mrf.mxu0 }
 0x443   :  { %v1771_v31 = vpop.f32.mrf.mxu0 }
 0x444   :  { %1879 = vrot.lane.b32.xlu1 %v1771_v31, %s2514_s22 }
 0x445   :  { %v2374_v17 = vpop.f32.mrf.mxu0 }
 0x447   :  { %v1869_v49 = vpop.f32.mrf.mxu0 }
 0x448   :  { %v1887_v15 = vrot.slane %v1869_v49, %v3427_v55  ;;  %v2068_v42 = vrot.slane %v1869_v49, %v3432_v28 }
 0x449   :  { %v1871_v40 = vpop.f32.mrf.mxu0 }
 0x44a   :  { %v1902_v24 = vsub.f32 %v1887_v15, %v1895_v14  ;;  %v1904_v0 = vsub.f32 %v1887_v15, %v1900_v34  ;;  %v2073_v3 = vsub.f32 %v2068_v42, %v1895_v14  ;;  %v2075_v62 = vsub.f32 %v2068_v42, %v1900_v34 }
 0x44b   :  { %v1891_v6 = vrot.slane %v1871_v40, %v3427_v55  ;;  %v2072_v32 = vrot.slane %v1871_v40, %v3432_v28 }
 0x44c   :  { %v1906_v7 = vmul.f32 %v1902_v24, %v1902_v24  ;;  %v1908_v2 = vmul.f32 %v1904_v0, %v1904_v0  ;;  %v2077_v27 = vmul.f32 %v2073_v3, %v2073_v3  ;;  %v2079_v21 = vmul.f32 %v2075_v62, %v2075_v62 }
 0x44d   :  { %v1903_v35 = vsub.f32 %v1891_v6, %v1895_v14  ;;  %v1905_v22 = vsub.f32 %v1891_v6, %v1900_v34  ;;  %v2074_v41 = vsub.f32 %v2072_v32, %v1895_v14  ;;  %v2076_v38 = vsub.f32 %v2072_v32, %v1900_v34 }
 0x44e   :  { %v1920_v10 = vmul.f32 %v1913_v23, %v1906_v7  ;;  %v1922_v61 = vmul.f32 %v1918_v46, %v1908_v2  ;;  %v2081_v52 = vmul.f32 %v2077_v27, %v1913_v23  ;;  %v2083_v51 = vmul.f32 %v2079_v21, %v1918_v46 }
 0x44f   :  { %v1907_v44 = vmul.f32 %v1903_v35, %v1903_v35  ;;  %v1909_v13 = vmul.f32 %v1905_v22, %v1905_v22  ;;  %v2078_v57 = vmul.f32 %v2074_v41, %v2074_v41  ;;  %v2080_v53 = vmul.f32 %v2076_v38, %v2076_v38 }
 0x450   :  { %v1924_v60 = vmul.f32 1.442695, %v1920_v10  ;;  %v1928_v26 = vmul.f32 1.442695, %v1922_v61  ;;  %v2085_v25 = vmul.f32 1.442695, %v2081_v52 }
 0x451   :  { %v1921_v39 = vmul.f32 %v1913_v23, %v1907_v44  ;;  %v1923_v54 = vmul.f32 %v1918_v46, %v1909_v13  ;;  %v2082_v56 = vmul.f32 %v2078_v57, %v1913_v23  ;;  %v2084_v16 = vmul.f32 %v2080_v53, %v1918_v46 }
 0x452   :  { %2495 = vpow2.f32 %v1924_v60  ;;  %v2089_v47 = vmul.f32 1.442695, %v2083_v51 }
 0x453   :  { %v1926_v5 = vmul.f32 1.442695, %v1921_v39  ;;  %v1930_v29 = vmul.f32 1.442695, %v1923_v54  ;;  %2497 = vpow2.f32 %v1928_v26  ;;  %v2087_v4 = vmul.f32 1.442695, %v2082_v56 }
 0x454   :  { %2499 = vpow2.f32 %v2085_v25  ;;  %v2091_v37 = vmul.f32 1.442695, %v2084_v16 }
 0x455   :  { %2501 = vpow2.f32 %v1926_v5 }
 0x456   :  { %2503 = vpow2.f32 %v1930_v29 }
 0x457   :  { %2505 = vpow2.f32 %v2087_v4 }
 0x458   :  { %2507 = vpow2.f32 %v2091_v37 }
 0x459   :  { %2509 = vpow2.f32 %v2089_v47 }
 0x45f   :  { %v2496_v45 = vpop.eup %2495 }
 0x460   :  { %v2498_v18 = vpop.eup %2497  ;;  %v1944_v50 = vmul.f32 %v2496_v45, %v1937_v59 }
 0x461   :  { %v2500_v43 = vpop.eup %2499  ;;  %v1946_v17 = vmul.f32 %v2498_v18, %v1937_v59 }
 0x462   :  { %v2502_v48 = vpop.eup %2501  ;;  %v2106_v33 = vmul.f32 %v2500_v43, %v2099_v20 }
 0x463   :  { %v2504_v58 = vpop.eup %2503  ;;  %v1945_v12 = vmul.f32 %v2502_v48, %v1941_v9 }
 0x464   :  { %v2506_v36 = vpop.eup %2505  ;;  %v1947_v63 = vmul.f32 %v2504_v58, %v1941_v9 }
 0x465   :  { %v2508_v30 = vpop.eup %2507  ;;  %2250 = vmatprep.mubr.msk.f32.mxu1 %vm1631_vm4, %v1945_v12  ;;  %v2107_v8 = vmul.f32 %v2506_v36, %v2103_v11 }
 0x466   :  { %2043 = vmatmul.mubr.f32.vlgmr.msra.gmra.mxu1 %v1944_v50  ;;  %v2510_v31 = vpop.eup %2509  ;;  %v2109_v28 = vmul.f32 %v2508_v30, %v2103_v11 }
 0x467   :  { %2253 = vmatprep.mubr.msk.f32.mxu0 %vm1631_vm4, %v2107_v8  ;;  %2251 = vmatprep.mubr.msk.f32.mxu1 %vm1631_vm4, %v1947_v63  ;;  %v2108_v55 = vmul.f32 %v2510_v31, %v2099_v20 }
 0x468   :  { %2205 = vmatmul.mubr.f32.vlgmr.msra.gmra.mxu0 %v2106_v33 }
 0x469   :  { %2254 = vmatprep.mubr.msk.f32.mxu0 %vm1631_vm4, %v2109_v28 }
 0x46a   :  { %2048 = vmatmul.mubr.f32.gmra.mxu1 %v1946_v17 }
 0x46c   :  { %2210 = vmatmul.mubr.f32.gmra.mxu0 %v2108_v55 }
 0x4b6   :  { %v1880_v14 = vpop.permute.xlu1 %1879 }
 0x4b7   :  { %1883 = vst.msk [vmem:[%s3772_s14] sm:$0xff] %vm1882_vm6, %v1880_v14 }
 0x526   :  { %v2044_v34 = vpop.f32.mrf.mxu1 }
 0x527   :  { %2055 = vrot.lane.b32.xlu0 %v2044_v34, %s2515_s26 }
 0x528   :  { %v2206_v49 = vpop.f32.mrf.mxu0  ;;  %v2046_v15 = vpop.f32.mrf.mxu1 }
 0x52a   :  { %v2208_v42 = vpop.f32.mrf.mxu0  ;;  %v2049_v40 = vpop.f32.mrf.mxu1 }
 0x52b   :  { %2057 = vrot.lane.b32.xlu1 %v2049_v40, %s2515_s26  ;;  %2217 = vrot.lane.b32.xlu0 %v2206_v49, %s2516_s27 }
 0x52c   :  { %v2211_v24 = vpop.f32.mrf.mxu0  ;;  %v2051_v0 = vpop.f32.mrf.mxu1 }
 0x52e   :  { %v2213_v3 = vpop.f32.mrf.mxu0 }
 0x52f   :  { %2219 = vrot.lane.b32.xlu1 %v2211_v24, %s2516_s27 }
 0x599   :  { %v2056_v62 = vpop.permute.xlu0 %2055 }
 0x59a   :  { %2062 = vst.msk [vmem:[%s3772_s14] sm:$0xff] %vm2061_vm7, %v2056_v62 }
 0x59d   :  { %v2218_v6 = vpop.permute.xlu0 %2217  ;;  %v2058_v32 = vpop.permute.xlu1 %2057 }
 0x59e   :  { %2224 = vst.msk [vmem:[%s3772_s14] sm:$0xff] %vm2223_vm8, %v2218_v6 }
 0x59f   :  { %2064 = vst.msk [vmem:[%s3772_s14 + $0x8] sm:$0x7] %vm2063_vm9, %v2058_v32 }
 0x5a1   :  { %v2220_v7 = vpop.permute.xlu1 %2219 }
 0x5a2   :  { %2226 = vst.msk [vmem:[%s3772_s14 + $0x8] sm:$0x7] %vm2225_vm10, %v2220_v7 }

</bundles_post_ra>
